<compile_context>
chip_gen: v6e
topology: v6e:2x2x1
jax: 0.10.0
libtpu: 0.0.40
codegen_flags: <defaults>
</compile_context>

<pallas_src>
import functools
import math

import jax
import jax.numpy as jnp
import numpy as np
from jax import lax
from jax.experimental import pallas as pl
from jax.experimental.pallas import tpu as pltpu

# ---- small BERT config --------------------------------------------------
VOCAB = 64
HIDDEN = 32
NUM_HEADS = 4
NUM_LAYERS = 2
INTERMEDIATE = 64
MAX_POS = 16
NUM_LABELS = 2
LN_EPS = 1e-12
LOGITS_PAD = 128  # lane-dense output width


def _ln(x, g, b, eps=LN_EPS):
    # var = E[x^2] - mu^2: the two reductions have no data dependency.
    mu = jnp.mean(x, axis=-1, keepdims=True)
    ms = jnp.mean(x * x, axis=-1, keepdims=True)
    var = jnp.maximum(ms - mu * mu, 0.0)
    return (x - mu) * lax.rsqrt(var + eps) * g + b


# ---- Pallas kernel: embeddings-LN + encoder + pooler + classifier (one batch block) ----
def bert_kernel(emb_ref, mask_ref, pos_ref, bdiag_ref,
                wqkv_ref, bqkv_ref, wo_ref, w1_ref, b1_ref, w2_ref, vecs_ref,
                wp_ref, wc_ref, gvecs_ref, bc_ref,
                out_ref, *, num_heads, num_layers, batch_block):
    emb = emb_ref[...]                       # (T, H) with T = BB*S flattened rows
    T, H = emb.shape
    BB = batch_block
    S = T // BB
    hd = H // num_heads
    bf = lambda a: a.astype(jnp.bfloat16)    # bf16 only at MXU operand boundaries

    gv = gvecs_ref[...]                      # (3, H): [ln_emb_g, ln_emb_b, pooler_b]
    # fused prologue: position/type add + embedding layernorm
    h = _ln(emb + pos_ref[...], gv[0:1, :], gv[1:2, :])          # (T, H) f32

    # additive attention mask, built once:
    #   block-diagonal bias (keeps batch rows independent) + key-padding mask
    kmask = mask_ref[...]                                        # (1, T): 1=attend, 0=pad
    addmask = (bdiag_ref[...] + (1.0 - kmask) * (-1e9))[None, :, :]   # (1, T, T)

    # statically unrolled encoder layers (L is tiny) -> cross-layer scheduling
    for l in range(num_layers):
        vec = vecs_ref[l]                    # (6, H): [bo, ln1_g, ln1_b, b2, ln2_g, ln2_b]

        # fused QKV projection, bf16 operands, f32 accumulation.
        # 1/sqrt(hd) is already folded into the Q columns of wqkv/bqkv.
        qkv = jnp.dot(bf(h), wqkv_ref[l],
                      preferred_element_type=jnp.float32) + bqkv_ref[l]   # (T, 3H) f32
        q = qkv[:, 0 * H:1 * H]
        k = qkv[:, 1 * H:2 * H]
        v = qkv[:, 2 * H:3 * H]

        # head-batched attention over the whole (BB*S) block (single batch dim einsums)
        qh = q.reshape(T, num_heads, hd)
        kh = k.reshape(T, num_heads, hd)
        vh = v.reshape(T, num_heads, hd)
        s = jnp.einsum('qnd,knd->nqk', qh, kh,
                       preferred_element_type=jnp.float32) + addmask      # (nh, T, T)
        m = jnp.max(s, axis=-1, keepdims=True)
        p = jnp.exp(s - m)
        p = p * pl.reciprocal(jnp.sum(p, axis=-1, keepdims=True), approx=True)
        ctx = jnp.einsum('nqk,knd->qnd', p, vh,
                         preferred_element_type=jnp.float32).reshape(T, H)

        attn = jnp.dot(bf(ctx), wo_ref[l],
                       preferred_element_type=jnp.float32) + vec[0:1, :]
        h1 = _ln(h + attn, vec[1:2, :], vec[2:3, :])

        f = jnp.dot(bf(h1), w1_ref[l],
                    preferred_element_type=jnp.float32) + b1_ref[l]
        # TODO(synk): HF BERT defaults to exact (erf) GELU; tanh approximation used here.
        f = jax.nn.gelu(f, approximate=True)
        f = jnp.dot(bf(f), w2_ref[l],
                    preferred_element_type=jnp.float32) + vec[3:4, :]
        h = _ln(h1 + f, vec[4:5, :], vec[5:6, :])

    # pooler ([CLS] row of every batch row in the block) + classifier
    cls = h.reshape(BB, S, H)[:, 0, :]                                    # (BB, H)
    pooled = jnp.tanh(jnp.dot(bf(cls), wp_ref[...],
                              preferred_element_type=jnp.float32) + gv[2:3, :])
    logits = jnp.dot(bf(pooled), wc_ref[...],
                     preferred_element_type=jnp.float32) + bc_ref[...]
    out_ref[...] = logits                                                 # (BB, 128)


# ---- parameter init (deterministic, synthetic, pre-packed / pre-folded) ----
def init_params(key):
    ks = iter(jax.random.split(key, 16))
    n = lambda shape, s=0.02: s * jax.random.normal(next(ks), shape, jnp.float32)
    L, H, I, C = NUM_LAYERS, HIDDEN, INTERMEDIATE, NUM_LABELS
    hd = H // NUM_HEADS
    inv_sqrt_hd = 1.0 / math.sqrt(hd)

    word_emb = n((VOCAB, H))
    pos_emb = n((MAX_POS, H))
    type_emb = n((2, H))
    # TODO(synk): token_type_ids hard-coded to type 0 (as in the original usage).
    pos_type = pos_emb + type_emb[0][None, :]                    # (MAX_POS, H)

    wqkv = n((L, H, 3 * H))
    bqkv = n((L, 1, 3 * H))
    # fold 1/sqrt(hd) into the Q projection (host-side, exact, free)
    wqkv = wqkv.at[:, :, :H].multiply(inv_sqrt_hd)
    bqkv = bqkv.at[:, :, :H].multiply(inv_sqrt_hd)

    wo = n((L, H, H))
    w1 = n((L, H, I))
    b1 = n((L, 1, I))
    w2 = n((L, I, H))

    bo = n((L, H))
    b2 = n((L, H))
    ones = jnp.ones((L, H), jnp.float32)
    zeros = jnp.zeros((L, H), jnp.float32)
    # rows: [bo, ln1_g, ln1_b, b2, ln2_g, ln2_b]
    vecs = jnp.stack([bo, ones, zeros, b2, ones, zeros], axis=1)          # (L, 6, H)

    wp = n((H, H))
    wc = n((H, C))
    bc = n((1, C))
    bp = n((1, H))
    wc_pad = jnp.zeros((H, LOGITS_PAD), jnp.float32).at[:, :C].set(wc)
    bc_pad = jnp.zeros((1, LOGITS_PAD), jnp.float32).at[:, :C].set(bc)
    # rows: [ln_emb_g, ln_emb_b, pooler_b]
    gvecs = jnp.concatenate([jnp.ones((1, H), jnp.float32),
                             jnp.zeros((1, H), jnp.float32), bp], axis=0)  # (3, H)

    bf16 = lambda a: a.astype(jnp.bfloat16)   # matmul weights stored in bf16
    return dict(word_emb=word_emb, pos_type=pos_type,
                wqkv=bf16(wqkv), bqkv=bqkv, wo=bf16(wo),
                w1=bf16(w1), b1=b1, w2=bf16(w2), vecs=vecs,
                wp=bf16(wp), wc_pad=bf16(wc_pad), gvecs=gvecs, bc_pad=bc_pad)


# ---- wrapper (mirrors BertWrapper.forward dispatch) -----------------------
def bert_wrapper_forward(params, inp, attention_mask=None):
    # TODO(synk): dropout layers of the original BERT are no-ops (eval mode).
    if inp.ndim > 2:
        embeds = inp.astype(jnp.float32)                 # inputs_embeds path
    else:
        # TODO(synk): embedding-table gather stays in XLA (no clean Pallas gather here).
        embeds = params['word_emb'][inp]                 # token-ids path
    B, S, H = embeds.shape
    if attention_mask is None:
        attention_mask = jnp.ones((B, S), jnp.float32)

    # batch blocking: BB rows per grid step (whole batch when B <= 8)
    if B <= 8:
        BB = B
    else:
        BB = next(c for c in (8, 4, 2, 1) if B % c == 0)
    nblk = B // BB
    T = BB * S

    embeds_r = embeds.reshape(nblk, T, H)
    mask_r = attention_mask.astype(jnp.float32).reshape(nblk, 1, T)
    pos_tiled = jnp.tile(params['pos_type'][:S], (BB, 1))                 # (T, H)

    # compile-time block-diagonal additive bias keeping batch rows independent
    bdiag_np = np.full((T, T), -1e9, np.float32)
    for i in range(BB):
        bdiag_np[i * S:(i + 1) * S, i * S:(i + 1) * S] = 0.0
    bdiag = jnp.asarray(bdiag_np)

    L, I, NH = NUM_LAYERS, INTERMEDIATE, NUM_HEADS
    hd = H // NH

    grid_spec = pltpu.PrefetchScalarGridSpec(
        num_scalar_prefetch=0,
        grid=(nblk,),
        in_specs=[
            pl.BlockSpec((None, T, H), lambda b: (b, 0, 0)),        # embeds (per block)
            pl.BlockSpec((None, 1, T), lambda b: (b, 0, 0)),        # key mask (per block)
            pl.BlockSpec((T, H), lambda b: (0, 0)),                 # pos+type rows (resident)
            pl.BlockSpec((T, T), lambda b: (0, 0)),                 # block-diag bias
            pl.BlockSpec((L, H, 3 * H), lambda b: (0, 0, 0)),       # wqkv (bf16, resident)
            pl.BlockSpec((L, 1, 3 * H), lambda b: (0, 0, 0)),       # bqkv
            pl.BlockSpec((L, H, H), lambda b: (0, 0, 0)),           # wo (bf16)
            pl.BlockSpec((L, H, I), lambda b: (0, 0, 0)),           # w1 (bf16)
            pl.BlockSpec((L, 1, I), lambda b: (0, 0, 0)),           # b1
            pl.BlockSpec((L, I, H), lambda b: (0, 0, 0)),           # w2 (bf16)
            pl.BlockSpec((L, 6, H), lambda b: (0, 0, 0)),           # per-layer bias/LN slab
            pl.BlockSpec((H, H), lambda b: (0, 0)),                 # wp (bf16)
            pl.BlockSpec((H, LOGITS_PAD), lambda b: (0, 0)),        # wc (bf16, lane-padded)
            pl.BlockSpec((3, H), lambda b: (0, 0)),                 # global bias/LN slab
            pl.BlockSpec((1, LOGITS_PAD), lambda b: (0, 0)),        # bc (lane-padded)
        ],
        out_specs=pl.BlockSpec((None, BB, LOGITS_PAD), lambda b: (b, 0, 0)),
    )

    # advisory cost estimate for the XLA scheduler
    flops_dense = 2 * B * S * (4 * H * H + 2 * H * I)               # per layer
    flops_attn = nblk * 4 * NH * T * T * hd                         # per layer
    flops_head = 2 * B * H * (H + LOGITS_PAD)
    flops = NUM_LAYERS * (flops_dense + flops_attn) + flops_head
    transcendentals = (NUM_LAYERS * (nblk * NH * T * T + B * S * I)
                       + B * H + (2 * NUM_LAYERS + 1) * B * S)
    operands = (embeds_r, mask_r, pos_tiled, bdiag,
                params['wqkv'], params['bqkv'], params['wo'], params['w1'],
                params['b1'], params['w2'], params['vecs'], params['wp'],
                params['wc_pad'], params['gvecs'], params['bc_pad'])
    bytes_accessed = int(sum(int(a.size) * a.dtype.itemsize for a in operands)
                         + nblk * BB * LOGITS_PAD * 4)
    cost = pl.CostEstimate(flops=int(flops), transcendentals=int(transcendentals),
                           bytes_accessed=bytes_accessed)

    out = pl.pallas_call(
        functools.partial(bert_kernel, num_heads=NH, num_layers=NUM_LAYERS,
                          batch_block=BB),
        out_shape=jax.ShapeDtypeStruct((nblk, BB, LOGITS_PAD), jnp.float32),
        grid_spec=grid_spec,
        compiler_params=pltpu.CompilerParams(
            dimension_semantics=("parallel",) if nblk > 1 else ("arbitrary",)),
        cost_estimate=cost,
    )(embeds_r, mask_r, pos_tiled, bdiag,
      params['wqkv'], params['bqkv'], params['wo'], params['w1'], params['b1'],
      params['w2'], params['vecs'], params['wp'], params['wc_pad'],
      params['gvecs'], params['bc_pad'])
    return out.reshape(B, LOGITS_PAD)[:, :NUM_LABELS]


# ---- pure-JAX reference (same bf16-at-matmul semantics, exact softmax) ----
def reference_forward(params, inp, attention_mask=None):
    bf = lambda a: a.astype(jnp.bfloat16)
    if inp.ndim > 2:
        embeds = inp.astype(jnp.float32)
    else:
        embeds = params['word_emb'][inp]
    B, S, H = embeds.shape
    nh, hd = NUM_HEADS, H // NUM_HEADS
    if attention_mask is None:
        attention_mask = jnp.ones((B, S), jnp.float32)
    neg = (1.0 - attention_mask.astype(jnp.float32))[:, None, None, :] * -1e9
    gv = params['gvecs']
    h = _ln(embeds + params['pos_type'][:S][None], gv[0:1], gv[1:2]).reshape(B * S, H)
    for l in range(NUM_LAYERS):
        vec = params['vecs'][l]
        qkv = jnp.dot(bf(h), params['wqkv'][l],
                      preferred_element_type=jnp.float32) + params['bqkv'][l]
        q, k, v = qkv[:, :H], qkv[:, H:2 * H], qkv[:, 2 * H:]
        qh = q.reshape(B, S, nh, hd)
        kh = k.reshape(B, S, nh, hd)
        vh = v.reshape(B, S, nh, hd)
        s = jnp.einsum('bqnd,bknd->bnqk', qh, kh) + neg     # 1/sqrt(hd) folded into wqkv
        p = jax.nn.softmax(s, axis=-1)
        ctx = jnp.einsum('bnqk,bknd->bqnd', p, vh).reshape(B * S, H)
        attn = jnp.dot(bf(ctx), params['wo'][l],
                       preferred_element_type=jnp.float32) + vec[0:1]
        h1 = _ln(h + attn, vec[1:2], vec[2:3])
        f = jax.nn.gelu(jnp.dot(bf(h1), params['w1'][l],
                                preferred_element_type=jnp.float32) + params['b1'][l],
                        approximate=True)
        f = jnp.dot(bf(f), params['w2'][l],
                    preferred_element_type=jnp.float32) + vec[3:4]
        h = _ln(h1 + f, vec[4:5], vec[5:6])
    cls = h.reshape(B, S, H)[:, 0, :]
    pooled = jnp.tanh(jnp.dot(bf(cls), params['wp'],
                              preferred_element_type=jnp.float32) + gv[2:3])
    logits = jnp.dot(bf(pooled), params['wc_pad'],
                     preferred_element_type=jnp.float32) + params['bc_pad']
    return logits[:, :NUM_LABELS]


if __name__ == "__main__":
    B, S = 2, 8
    key = jax.random.PRNGKey(0)
    kp, kid, kemb = jax.random.split(key, 3)
    params = init_params(kp)

    # 2-D path: token ids + attention mask (last two tokens of batch row 1 padded).
    input_ids = jax.random.randint(kid, (B, S), 0, VOCAB, dtype=jnp.int32)
    attn_mask = jnp.ones((B, S), jnp.float32).at[1, -2:].set(0.0)

    logits_ids = jax.block_until_ready(bert_wrapper_forward(params, input_ids, attn_mask))
    ref_ids = reference_forward(params, input_ids, attn_mask)
    np.testing.assert_allclose(np.asarray(logits_ids), np.asarray(ref_ids),
                               rtol=2e-3, atol=2e-3)

    # 3-D path: inputs_embeds.
    inputs_embeds = 0.02 * jax.random.normal(kemb, (B, S, HIDDEN), jnp.float32)
    logits_emb = jax.block_until_ready(bert_wrapper_forward(params, inputs_embeds, None))
    ref_emb = reference_forward(params, inputs_embeds, None)
    np.testing.assert_allclose(np.asarray(logits_emb), np.asarray(ref_emb),
                               rtol=2e-3, atol=2e-3)

    assert logits_ids.shape == (B, NUM_LABELS) and logits_emb.shape == (B, NUM_LABELS)
    print("KERNEL_OK")
</pallas_src>

<mosaic_0001>
module attributes {stable_mosaic.version = 11 : i64} {
  func.func @bert_kernel(%arg0: i32, %arg1: memref<1x16x32xf32, #tpu.memory_space<vmem>>, %arg2: memref<1x1x16xf32, #tpu.memory_space<vmem>>, %arg3: memref<16x32xf32, #tpu.memory_space<vmem>>, %arg4: memref<16x16xf32, #tpu.memory_space<vmem>>, %arg5: memref<2x32x96xbf16, #tpu.memory_space<vmem>>, %arg6: memref<2x1x96xf32, #tpu.memory_space<vmem>>, %arg7: memref<2x32x32xbf16, #tpu.memory_space<vmem>>, %arg8: memref<2x32x64xbf16, #tpu.memory_space<vmem>>, %arg9: memref<2x1x64xf32, #tpu.memory_space<vmem>>, %arg10: memref<2x64x32xbf16, #tpu.memory_space<vmem>>, %arg11: memref<2x6x32xf32, #tpu.memory_space<vmem>>, %arg12: memref<32x32xbf16, #tpu.memory_space<vmem>>, %arg13: memref<32x128xbf16, #tpu.memory_space<vmem>>, %arg14: memref<3x32xf32, #tpu.memory_space<vmem>>, %arg15: memref<1x128xf32, #tpu.memory_space<vmem>>, %arg16: memref<1x2x128xf32, #tpu.memory_space<vmem>>) attributes {dimension_semantics = [#tpu.dimension_semantics<arbitrary>], iteration_bounds = array<i64: 1>, scalar_prefetch = 0 : i64, scratch_operands = 0 : i64, tpu.core_type = #tpu.core_type<tc>, window_params = [{transform_indices = @transform_0, window_bounds = array<i64: 1, 16, 32>}, {transform_indices = @transform_1, window_bounds = array<i64: 1, 1, 16>}, {pipeline_mode = #tpu.pipeline_mode<synchronous>, transform_indices = @transform_2, window_bounds = array<i64: 16, 32>}, {pipeline_mode = #tpu.pipeline_mode<synchronous>, transform_indices = @transform_3, window_bounds = array<i64: 16, 16>}, {pipeline_mode = #tpu.pipeline_mode<synchronous>, transform_indices = @transform_4, window_bounds = array<i64: 2, 32, 96>}, {pipeline_mode = #tpu.pipeline_mode<synchronous>, transform_indices = @transform_5, window_bounds = array<i64: 2, 1, 96>}, {pipeline_mode = #tpu.pipeline_mode<synchronous>, transform_indices = @transform_6, window_bounds = array<i64: 2, 32, 32>}, {pipeline_mode = #tpu.pipeline_mode<synchronous>, transform_indices = @transform_7, window_bounds = array<i64: 2, 32, 64>}, {pipeline_mode = #tpu.pipeline_mode<synchronous>, transform_indices = @transform_8, window_bounds = array<i64: 2, 1, 64>}, {pipeline_mode = #tpu.pipeline_mode<synchronous>, transform_indices = @transform_9, window_bounds = array<i64: 2, 64, 32>}, {pipeline_mode = #tpu.pipeline_mode<synchronous>, transform_indices = @transform_10, window_bounds = array<i64: 2, 6, 32>}, {pipeline_mode = #tpu.pipeline_mode<synchronous>, transform_indices = @transform_11, window_bounds = array<i64: 32, 32>}, {pipeline_mode = #tpu.pipeline_mode<synchronous>, transform_indices = @transform_12, window_bounds = array<i64: 32, 128>}, {pipeline_mode = #tpu.pipeline_mode<synchronous>, transform_indices = @transform_13, window_bounds = array<i64: 3, 32>}, {pipeline_mode = #tpu.pipeline_mode<synchronous>, transform_indices = @transform_14, window_bounds = array<i64: 1, 128>}, {transform_indices = @transform_15, window_bounds = array<i64: 1, 2, 128>}]} {
    %c0 = arith.constant 0 : index
    %c0_0 = arith.constant 0 : index
    %c0_1 = arith.constant 0 : index
    %0 = vector.load %arg1[%c0, %c0_0, %c0_1] : memref<1x16x32xf32, #tpu.memory_space<vmem>>, vector<1x16x32xf32>
    %1 = vector.shape_cast %0 : vector<1x16x32xf32> to vector<16x32xf32>
    %c0_2 = arith.constant 0 : index
    %c0_3 = arith.constant 0 : index
    %2 = vector.load %arg14[%c0_2, %c0_3] : memref<3x32xf32, #tpu.memory_space<vmem>>, vector<3x32xf32>
    %c0_4 = arith.constant 0 : index
    %c0_5 = arith.constant 0 : index
    %3 = vector.load %arg3[%c0_4, %c0_5] : memref<16x32xf32, #tpu.memory_space<vmem>>, vector<16x32xf32>
    %4 = arith.addf %1, %3 : vector<16x32xf32>
    %5 = vector.extract_strided_slice %2 {offsets = [0, 0], sizes = [1, 32], strides = [1, 1]} : vector<3x32xf32> to vector<1x32xf32>
    %6 = vector.extract_strided_slice %2 {offsets = [1, 0], sizes = [1, 32], strides = [1, 1]} : vector<3x32xf32> to vector<1x32xf32>
    %cst = arith.constant dense<0.000000e+00> : vector<16xf32>
    %7 = vector.multi_reduction <add>, %4, %cst [1] : vector<16x32xf32> to vector<16xf32>
    %8 = vector.shape_cast %7 : vector<16xf32> to vector<16x1xf32>
    %cst_6 = arith.constant 3.200000e+01 : f32
    %9 = vector.broadcast %cst_6 : f32 to vector<16x1xf32>
    %10 = arith.divf %8, %9 : vector<16x1xf32>
    %11 = arith.mulf %4, %4 : vector<16x32xf32>
    %cst_7 = arith.constant dense<0.000000e+00> : vector<16xf32>
    %12 = vector.multi_reduction <add>, %11, %cst_7 [1] : vector<16x32xf32> to vector<16xf32>
    %13 = vector.shape_cast %12 : vector<16xf32> to vector<16x1xf32>
    %cst_8 = arith.constant 3.200000e+01 : f32
    %14 = vector.broadcast %cst_8 : f32 to vector<16x1xf32>
    %15 = arith.divf %13, %14 : vector<16x1xf32>
    %16 = arith.mulf %10, %10 : vector<16x1xf32>
    %17 = arith.subf %15, %16 : vector<16x1xf32>
    %cst_9 = arith.constant 0.000000e+00 : f32
    %18 = vector.broadcast %cst_9 : f32 to vector<16x1xf32>
    %19 = arith.maximumf %17, %18 : vector<16x1xf32>
    %20 = vector.broadcast %10 : vector<16x1xf32> to vector<16x32xf32>
    %21 = arith.subf %4, %20 : vector<16x32xf32>
    %cst_10 = arith.constant 9.99999996E-13 : f32
    %22 = vector.broadcast %cst_10 : f32 to vector<16x1xf32>
    %23 = arith.addf %19, %22 : vector<16x1xf32>
    %24 = math.rsqrt %23 : vector<16x1xf32>
    %25 = vector.broadcast %24 : vector<16x1xf32> to vector<16x32xf32>
    %26 = arith.mulf %21, %25 : vector<16x32xf32>
    %27 = vector.broadcast %5 : vector<1x32xf32> to vector<16x32xf32>
    %28 = arith.mulf %26, %27 : vector<16x32xf32>
    %29 = vector.broadcast %6 : vector<1x32xf32> to vector<16x32xf32>
    %30 = arith.addf %28, %29 : vector<16x32xf32>
    %c0_11 = arith.constant 0 : index
    %c0_12 = arith.constant 0 : index
    %c0_13 = arith.constant 0 : index
    %31 = vector.load %arg2[%c0_11, %c0_12, %c0_13] : memref<1x1x16xf32, #tpu.memory_space<vmem>>, vector<1x1x16xf32>
    %32 = vector.shape_cast %31 : vector<1x1x16xf32> to vector<1x16xf32>
    %c0_14 = arith.constant 0 : index
    %c0_15 = arith.constant 0 : index
    %33 = vector.load %arg4[%c0_14, %c0_15] : memref<16x16xf32, #tpu.memory_space<vmem>>, vector<16x16xf32>
    %cst_16 = arith.constant 1.000000e+00 : f32
    %34 = vector.broadcast %cst_16 : f32 to vector<1x16xf32>
    %35 = arith.subf %34, %32 : vector<1x16xf32>
    %cst_17 = arith.constant -1.000000e+09 : f32
    %36 = vector.broadcast %cst_17 : f32 to vector<1x16xf32>
    %37 = arith.mulf %35, %36 : vector<1x16xf32>
    %38 = vector.broadcast %37 : vector<1x16xf32> to vector<16x16xf32>
    %39 = arith.addf %33, %38 : vector<16x16xf32>
    %40 = vector.shape_cast %39 : vector<16x16xf32> to vector<1x16x16xf32>
    %c0_18 = arith.constant 0 : index
    %c0_19 = arith.constant 0 : index
    %c0_20 = arith.constant 0 : index
    %41 = vector.load %arg11[%c0_18, %c0_19, %c0_20] : memref<2x6x32xf32, #tpu.memory_space<vmem>>, vector<1x6x32xf32>
    %42 = vector.shape_cast %41 : vector<1x6x32xf32> to vector<6x32xf32>
    %43 = arith.truncf %30 : vector<16x32xf32> to vector<16x32xbf16>
    %c0_21 = arith.constant 0 : index
    %c0_22 = arith.constant 0 : index
    %c0_23 = arith.constant 0 : index
    %44 = vector.load %arg5[%c0_21, %c0_22, %c0_23] : memref<2x32x96xbf16, #tpu.memory_space<vmem>>, vector<1x32x96xbf16>
    %45 = vector.shape_cast %44 : vector<1x32x96xbf16> to vector<32x96xbf16>
    %cst_24 = arith.constant dense<0.000000e+00> : vector<16x96xf32>
    %46 = tpu.matmul %43, %45, %cst_24 {dimension_numbers = #tpu.dot_dimension_numbers<[1], [0], [0], [1], [0, 0, 1, 1], [], []>} : vector<16x32xbf16>, vector<32x96xbf16>, vector<16x96xf32> -> vector<16x96xf32>
    %c0_25 = arith.constant 0 : index
    %c0_26 = arith.constant 0 : index
    %c0_27 = arith.constant 0 : index
    %47 = vector.load %arg6[%c0_25, %c0_26, %c0_27] : memref<2x1x96xf32, #tpu.memory_space<vmem>>, vector<1x1x96xf32>
    %48 = vector.shape_cast %47 : vector<1x1x96xf32> to vector<1x96xf32>
    %49 = vector.broadcast %48 : vector<1x96xf32> to vector<16x96xf32>
    %50 = arith.addf %46, %49 : vector<16x96xf32>
    %51 = vector.extract_strided_slice %50 {offsets = [0, 0], sizes = [16, 32], strides = [1, 1]} : vector<16x96xf32> to vector<16x32xf32>
    %52 = vector.extract_strided_slice %50 {offsets = [0, 32], sizes = [16, 32], strides = [1, 1]} : vector<16x96xf32> to vector<16x32xf32>
    %53 = vector.extract_strided_slice %50 {offsets = [0, 64], sizes = [16, 32], strides = [1, 1]} : vector<16x96xf32> to vector<16x32xf32>
    %54 = vector.shape_cast %51 : vector<16x32xf32> to vector<16x4x8xf32>
    %55 = vector.shape_cast %52 : vector<16x32xf32> to vector<16x4x8xf32>
    %56 = vector.shape_cast %53 : vector<16x32xf32> to vector<16x4x8xf32>
    "tpu.trace_start"() <{level = 10 : i32, message = "qnd,knd->nqk"}> : () -> ()
    %cst_28 = arith.constant dense<0.000000e+00> : vector<4x16x16xf32>
    %57 = tpu.matmul %54, %55, %cst_28 {dimension_numbers = #tpu.dot_dimension_numbers<[2], [2], [0], [0], [0, 1, 0, 0, 1, 0], [1], [1]>} : vector<16x4x8xf32>, vector<16x4x8xf32>, vector<4x16x16xf32> -> vector<4x16x16xf32>
    "tpu.trace_stop"() : () -> ()
    %58 = vector.broadcast %40 : vector<1x16x16xf32> to vector<4x16x16xf32>
    %59 = arith.addf %57, %58 : vector<4x16x16xf32>
    %cst_29 = arith.constant dense<0xFF800000> : vector<4x16xf32>
    %60 = vector.multi_reduction <maximumf>, %59, %cst_29 [2] : vector<4x16x16xf32> to vector<4x16xf32>
    %61 = vector.shape_cast %60 : vector<4x16xf32> to vector<4x16x1xf32>
    %62 = vector.broadcast %61 : vector<4x16x1xf32> to vector<4x16x16xf32>
    %63 = arith.subf %59, %62 : vector<4x16x16xf32>
    %64 = math.exp %63 : vector<4x16x16xf32>
    %cst_30 = arith.constant dense<0.000000e+00> : vector<4x16xf32>
    %65 = vector.multi_reduction <add>, %64, %cst_30 [2] : vector<4x16x16xf32> to vector<4x16xf32>
    %66 = vector.shape_cast %65 : vector<4x16xf32> to vector<4x16x1xf32>
    %67 = tpu.reciprocal %66 {approx = true} : vector<4x16x1xf32> -> vector<4x16x1xf32>
    %68 = vector.broadcast %67 : vector<4x16x1xf32> to vector<4x16x16xf32>
    %69 = arith.mulf %64, %68 : vector<4x16x16xf32>
    "tpu.trace_start"() <{level = 10 : i32, message = "nqk,knd->qnd"}> : () -> ()
    %cst_31 = arith.constant dense<0.000000e+00> : vector<4x8x16xf32>
    %70 = tpu.matmul %56, %69, %cst_31 {dimension_numbers = #tpu.dot_dimension_numbers<[0], [2], [2], [1], [0, 1, 0, 2, 1, 1], [1], [0]>} : vector<16x4x8xf32>, vector<4x16x16xf32>, vector<4x8x16xf32> -> vector<4x8x16xf32>
    %71 = tpu.transpose %70, [2, 0, 1] : vector<4x8x16xf32> -> vector<16x4x8xf32>
    "tpu.trace_stop"() : () -> ()
    %72 = vector.shape_cast %71 : vector<16x4x8xf32> to vector<16x32xf32>
    %73 = arith.truncf %72 : vector<16x32xf32> to vector<16x32xbf16>
    %c0_32 = arith.constant 0 : index
    %c0_33 = arith.constant 0 : index
    %c0_34 = arith.constant 0 : index
    %74 = vector.load %arg7[%c0_32, %c0_33, %c0_34] : memref<2x32x32xbf16, #tpu.memory_space<vmem>>, vector<1x32x32xbf16>
    %75 = vector.shape_cast %74 : vector<1x32x32xbf16> to vector<32x32xbf16>
    %cst_35 = arith.constant dense<0.000000e+00> : vector<16x32xf32>
    %76 = tpu.matmul %73, %75, %cst_35 {dimension_numbers = #tpu.dot_dimension_numbers<[1], [0], [0], [1], [0, 0, 1, 1], [], []>} : vector<16x32xbf16>, vector<32x32xbf16>, vector<16x32xf32> -> vector<16x32xf32>
    %77 = vector.extract_strided_slice %42 {offsets = [0, 0], sizes = [1, 32], strides = [1, 1]} : vector<6x32xf32> to vector<1x32xf32>
    %78 = vector.broadcast %77 : vector<1x32xf32> to vector<16x32xf32>
    %79 = arith.addf %76, %78 : vector<16x32xf32>
    %80 = arith.addf %30, %79 : vector<16x32xf32>
    %81 = vector.extract_strided_slice %42 {offsets = [1, 0], sizes = [1, 32], strides = [1, 1]} : vector<6x32xf32> to vector<1x32xf32>
    %82 = vector.extract_strided_slice %42 {offsets = [2, 0], sizes = [1, 32], strides = [1, 1]} : vector<6x32xf32> to vector<1x32xf32>
    %cst_36 = arith.constant dense<0.000000e+00> : vector<16xf32>
    %83 = vector.multi_reduction <add>, %80, %cst_36 [1] : vector<16x32xf32> to vector<16xf32>
    %84 = vector.shape_cast %83 : vector<16xf32> to vector<16x1xf32>
    %cst_37 = arith.constant 3.200000e+01 : f32
    %85 = vector.broadcast %cst_37 : f32 to vector<16x1xf32>
    %86 = arith.divf %84, %85 : vector<16x1xf32>
    %87 = arith.mulf %80, %80 : vector<16x32xf32>
    %cst_38 = arith.constant dense<0.000000e+00> : vector<16xf32>
    %88 = vector.multi_reduction <add>, %87, %cst_38 [1] : vector<16x32xf32> to vector<16xf32>
    %89 = vector.shape_cast %88 : vector<16xf32> to vector<16x1xf32>
    %cst_39 = arith.constant 3.200000e+01 : f32
    %90 = vector.broadcast %cst_39 : f32 to vector<16x1xf32>
    %91 = arith.divf %89, %90 : vector<16x1xf32>
    %92 = arith.mulf %86, %86 : vector<16x1xf32>
    %93 = arith.subf %91, %92 : vector<16x1xf32>
    %cst_40 = arith.constant 0.000000e+00 : f32
    %94 = vector.broadcast %cst_40 : f32 to vector<16x1xf32>
    %95 = arith.maximumf %93, %94 : vector<16x1xf32>
    %96 = vector.broadcast %86 : vector<16x1xf32> to vector<16x32xf32>
    %97 = arith.subf %80, %96 : vector<16x32xf32>
    %cst_41 = arith.constant 9.99999996E-13 : f32
    %98 = vector.broadcast %cst_41 : f32 to vector<16x1xf32>
    %99 = arith.addf %95, %98 : vector<16x1xf32>
    %100 = math.rsqrt %99 : vector<16x1xf32>
    %101 = vector.broadcast %100 : vector<16x1xf32> to vector<16x32xf32>
    %102 = arith.mulf %97, %101 : vector<16x32xf32>
    %103 = vector.broadcast %81 : vector<1x32xf32> to vector<16x32xf32>
    %104 = arith.mulf %102, %103 : vector<16x32xf32>
    %105 = vector.broadcast %82 : vector<1x32xf32> to vector<16x32xf32>
    %106 = arith.addf %104, %105 : vector<16x32xf32>
    %107 = arith.truncf %106 : vector<16x32xf32> to vector<16x32xbf16>
    %c0_42 = arith.constant 0 : index
    %c0_43 = arith.constant 0 : index
    %c0_44 = arith.constant 0 : index
    %108 = vector.load %arg8[%c0_42, %c0_43, %c0_44] : memref<2x32x64xbf16, #tpu.memory_space<vmem>>, vector<1x32x64xbf16>
    %109 = vector.shape_cast %108 : vector<1x32x64xbf16> to vector<32x64xbf16>
    %cst_45 = arith.constant dense<0.000000e+00> : vector<16x64xf32>
    %110 = tpu.matmul %107, %109, %cst_45 {dimension_numbers = #tpu.dot_dimension_numbers<[1], [0], [0], [1], [0, 0, 1, 1], [], []>} : vector<16x32xbf16>, vector<32x64xbf16>, vector<16x64xf32> -> vector<16x64xf32>
    %c0_46 = arith.constant 0 : index
    %c0_47 = arith.constant 0 : index
    %c0_48 = arith.constant 0 : index
    %111 = vector.load %arg9[%c0_46, %c0_47, %c0_48] : memref<2x1x64xf32, #tpu.memory_space<vmem>>, vector<1x1x64xf32>
    %112 = vector.shape_cast %111 : vector<1x1x64xf32> to vector<1x64xf32>
    %113 = vector.broadcast %112 : vector<1x64xf32> to vector<16x64xf32>
    %114 = arith.addf %110, %113 : vector<16x64xf32>
    %115 = arith.mulf %114, %114 : vector<16x64xf32>
    %116 = arith.mulf %114, %115 : vector<16x64xf32>
    %cst_49 = arith.constant 4.471500e-02 : f32
    %117 = vector.broadcast %cst_49 : f32 to vector<16x64xf32>
    %118 = arith.mulf %117, %116 : vector<16x64xf32>
    %119 = arith.addf %114, %118 : vector<16x64xf32>
    %cst_50 = arith.constant 0.797884583 : f32
    %120 = vector.broadcast %cst_50 : f32 to vector<16x64xf32>
    %121 = arith.mulf %120, %119 : vector<16x64xf32>
    %122 = math.tanh %121 : vector<16x64xf32>
    %cst_51 = arith.constant 1.000000e+00 : f32
    %123 = vector.broadcast %cst_51 : f32 to vector<16x64xf32>
    %124 = arith.addf %123, %122 : vector<16x64xf32>
    %cst_52 = arith.constant 5.000000e-01 : f32
    %125 = vector.broadcast %cst_52 : f32 to vector<16x64xf32>
    %126 = arith.mulf %125, %124 : vector<16x64xf32>
    %127 = arith.mulf %114, %126 : vector<16x64xf32>
    %128 = arith.truncf %127 : vector<16x64xf32> to vector<16x64xbf16>
    %c0_53 = arith.constant 0 : index
    %c0_54 = arith.constant 0 : index
    %c0_55 = arith.constant 0 : index
    %129 = vector.load %arg10[%c0_53, %c0_54, %c0_55] : memref<2x64x32xbf16, #tpu.memory_space<vmem>>, vector<1x64x32xbf16>
    %130 = vector.shape_cast %129 : vector<1x64x32xbf16> to vector<64x32xbf16>
    %cst_56 = arith.constant dense<0.000000e+00> : vector<16x32xf32>
    %131 = tpu.matmul %128, %130, %cst_56 {dimension_numbers = #tpu.dot_dimension_numbers<[1], [0], [0], [1], [0, 0, 1, 1], [], []>} : vector<16x64xbf16>, vector<64x32xbf16>, vector<16x32xf32> -> vector<16x32xf32>
    %132 = vector.extract_strided_slice %42 {offsets = [3, 0], sizes = [1, 32], strides = [1, 1]} : vector<6x32xf32> to vector<1x32xf32>
    %133 = vector.broadcast %132 : vector<1x32xf32> to vector<16x32xf32>
    %134 = arith.addf %131, %133 : vector<16x32xf32>
    %135 = arith.addf %106, %134 : vector<16x32xf32>
    %136 = vector.extract_strided_slice %42 {offsets = [4, 0], sizes = [1, 32], strides = [1, 1]} : vector<6x32xf32> to vector<1x32xf32>
    %137 = vector.extract_strided_slice %42 {offsets = [5, 0], sizes = [1, 32], strides = [1, 1]} : vector<6x32xf32> to vector<1x32xf32>
    %cst_57 = arith.constant dense<0.000000e+00> : vector<16xf32>
    %138 = vector.multi_reduction <add>, %135, %cst_57 [1] : vector<16x32xf32> to vector<16xf32>
    %139 = vector.shape_cast %138 : vector<16xf32> to vector<16x1xf32>
    %cst_58 = arith.constant 3.200000e+01 : f32
    %140 = vector.broadcast %cst_58 : f32 to vector<16x1xf32>
    %141 = arith.divf %139, %140 : vector<16x1xf32>
    %142 = arith.mulf %135, %135 : vector<16x32xf32>
    %cst_59 = arith.constant dense<0.000000e+00> : vector<16xf32>
    %143 = vector.multi_reduction <add>, %142, %cst_59 [1] : vector<16x32xf32> to vector<16xf32>
    %144 = vector.shape_cast %143 : vector<16xf32> to vector<16x1xf32>
    %cst_60 = arith.constant 3.200000e+01 : f32
    %145 = vector.broadcast %cst_60 : f32 to vector<16x1xf32>
    %146 = arith.divf %144, %145 : vector<16x1xf32>
    %147 = arith.mulf %141, %141 : vector<16x1xf32>
    %148 = arith.subf %146, %147 : vector<16x1xf32>
    %cst_61 = arith.constant 0.000000e+00 : f32
    %149 = vector.broadcast %cst_61 : f32 to vector<16x1xf32>
    %150 = arith.maximumf %148, %149 : vector<16x1xf32>
    %151 = vector.broadcast %141 : vector<16x1xf32> to vector<16x32xf32>
    %152 = arith.subf %135, %151 : vector<16x32xf32>
    %cst_62 = arith.constant 9.99999996E-13 : f32
    %153 = vector.broadcast %cst_62 : f32 to vector<16x1xf32>
    %154 = arith.addf %150, %153 : vector<16x1xf32>
    %155 = math.rsqrt %154 : vector<16x1xf32>
    %156 = vector.broadcast %155 : vector<16x1xf32> to vector<16x32xf32>
    %157 = arith.mulf %152, %156 : vector<16x32xf32>
    %158 = vector.broadcast %136 : vector<1x32xf32> to vector<16x32xf32>
    %159 = arith.mulf %157, %158 : vector<16x32xf32>
    %160 = vector.broadcast %137 : vector<1x32xf32> to vector<16x32xf32>
    %161 = arith.addf %159, %160 : vector<16x32xf32>
    %c1 = arith.constant 1 : index
    %c0_63 = arith.constant 0 : index
    %c0_64 = arith.constant 0 : index
    %162 = vector.load %arg11[%c1, %c0_63, %c0_64] : memref<2x6x32xf32, #tpu.memory_space<vmem>>, vector<1x6x32xf32>
    %163 = vector.shape_cast %162 : vector<1x6x32xf32> to vector<6x32xf32>
    %164 = arith.truncf %161 : vector<16x32xf32> to vector<16x32xbf16>
    %c1_65 = arith.constant 1 : index
    %c0_66 = arith.constant 0 : index
    %c0_67 = arith.constant 0 : index
    %165 = vector.load %arg5[%c1_65, %c0_66, %c0_67] : memref<2x32x96xbf16, #tpu.memory_space<vmem>>, vector<1x32x96xbf16>
    %166 = vector.shape_cast %165 : vector<1x32x96xbf16> to vector<32x96xbf16>
    %cst_68 = arith.constant dense<0.000000e+00> : vector<16x96xf32>
    %167 = tpu.matmul %164, %166, %cst_68 {dimension_numbers = #tpu.dot_dimension_numbers<[1], [0], [0], [1], [0, 0, 1, 1], [], []>} : vector<16x32xbf16>, vector<32x96xbf16>, vector<16x96xf32> -> vector<16x96xf32>
    %c1_69 = arith.constant 1 : index
    %c0_70 = arith.constant 0 : index
    %c0_71 = arith.constant 0 : index
    %168 = vector.load %arg6[%c1_69, %c0_70, %c0_71] : memref<2x1x96xf32, #tpu.memory_space<vmem>>, vector<1x1x96xf32>
    %169 = vector.shape_cast %168 : vector<1x1x96xf32> to vector<1x96xf32>
    %170 = vector.broadcast %169 : vector<1x96xf32> to vector<16x96xf32>
    %171 = arith.addf %167, %170 : vector<16x96xf32>
    %172 = vector.extract_strided_slice %171 {offsets = [0, 0], sizes = [16, 32], strides = [1, 1]} : vector<16x96xf32> to vector<16x32xf32>
    %173 = vector.extract_strided_slice %171 {offsets = [0, 32], sizes = [16, 32], strides = [1, 1]} : vector<16x96xf32> to vector<16x32xf32>
    %174 = vector.extract_strided_slice %171 {offsets = [0, 64], sizes = [16, 32], strides = [1, 1]} : vector<16x96xf32> to vector<16x32xf32>
    %175 = vector.shape_cast %172 : vector<16x32xf32> to vector<16x4x8xf32>
    %176 = vector.shape_cast %173 : vector<16x32xf32> to vector<16x4x8xf32>
    %177 = vector.shape_cast %174 : vector<16x32xf32> to vector<16x4x8xf32>
    "tpu.trace_start"() <{level = 10 : i32, message = "qnd,knd->nqk"}> : () -> ()
    %cst_72 = arith.constant dense<0.000000e+00> : vector<4x16x16xf32>
    %178 = tpu.matmul %175, %176, %cst_72 {dimension_numbers = #tpu.dot_dimension_numbers<[2], [2], [0], [0], [0, 1, 0, 0, 1, 0], [1], [1]>} : vector<16x4x8xf32>, vector<16x4x8xf32>, vector<4x16x16xf32> -> vector<4x16x16xf32>
    "tpu.trace_stop"() : () -> ()
    %179 = vector.broadcast %40 : vector<1x16x16xf32> to vector<4x16x16xf32>
    %180 = arith.addf %178, %179 : vector<4x16x16xf32>
    %cst_73 = arith.constant dense<0xFF800000> : vector<4x16xf32>
    %181 = vector.multi_reduction <maximumf>, %180, %cst_73 [2] : vector<4x16x16xf32> to vector<4x16xf32>
    %182 = vector.shape_cast %181 : vector<4x16xf32> to vector<4x16x1xf32>
    %183 = vector.broadcast %182 : vector<4x16x1xf32> to vector<4x16x16xf32>
    %184 = arith.subf %180, %183 : vector<4x16x16xf32>
    %185 = math.exp %184 : vector<4x16x16xf32>
    %cst_74 = arith.constant dense<0.000000e+00> : vector<4x16xf32>
    %186 = vector.multi_reduction <add>, %185, %cst_74 [2] : vector<4x16x16xf32> to vector<4x16xf32>
    %187 = vector.shape_cast %186 : vector<4x16xf32> to vector<4x16x1xf32>
    %188 = tpu.reciprocal %187 {approx = true} : vector<4x16x1xf32> -> vector<4x16x1xf32>
    %189 = vector.broadcast %188 : vector<4x16x1xf32> to vector<4x16x16xf32>
    %190 = arith.mulf %185, %189 : vector<4x16x16xf32>
    "tpu.trace_start"() <{level = 10 : i32, message = "nqk,knd->qnd"}> : () -> ()
    %cst_75 = arith.constant dense<0.000000e+00> : vector<4x8x16xf32>
    %191 = tpu.matmul %177, %190, %cst_75 {dimension_numbers = #tpu.dot_dimension_numbers<[0], [2], [2], [1], [0, 1, 0, 2, 1, 1], [1], [0]>} : vector<16x4x8xf32>, vector<4x16x16xf32>, vector<4x8x16xf32> -> vector<4x8x16xf32>
    %192 = tpu.transpose %191, [2, 0, 1] : vector<4x8x16xf32> -> vector<16x4x8xf32>
    "tpu.trace_stop"() : () -> ()
    %193 = vector.shape_cast %192 : vector<16x4x8xf32> to vector<16x32xf32>
    %194 = arith.truncf %193 : vector<16x32xf32> to vector<16x32xbf16>
    %c1_76 = arith.constant 1 : index
    %c0_77 = arith.constant 0 : index
    %c0_78 = arith.constant 0 : index
    %195 = vector.load %arg7[%c1_76, %c0_77, %c0_78] : memref<2x32x32xbf16, #tpu.memory_space<vmem>>, vector<1x32x32xbf16>
    %196 = vector.shape_cast %195 : vector<1x32x32xbf16> to vector<32x32xbf16>
    %cst_79 = arith.constant dense<0.000000e+00> : vector<16x32xf32>
    %197 = tpu.matmul %194, %196, %cst_79 {dimension_numbers = #tpu.dot_dimension_numbers<[1], [0], [0], [1], [0, 0, 1, 1], [], []>} : vector<16x32xbf16>, vector<32x32xbf16>, vector<16x32xf32> -> vector<16x32xf32>
    %198 = vector.extract_strided_slice %163 {offsets = [0, 0], sizes = [1, 32], strides = [1, 1]} : vector<6x32xf32> to vector<1x32xf32>
    %199 = vector.broadcast %198 : vector<1x32xf32> to vector<16x32xf32>
    %200 = arith.addf %197, %199 : vector<16x32xf32>
    %201 = arith.addf %161, %200 : vector<16x32xf32>
    %202 = vector.extract_strided_slice %163 {offsets = [1, 0], sizes = [1, 32], strides = [1, 1]} : vector<6x32xf32> to vector<1x32xf32>
    %203 = vector.extract_strided_slice %163 {offsets = [2, 0], sizes = [1, 32], strides = [1, 1]} : vector<6x32xf32> to vector<1x32xf32>
    %cst_80 = arith.constant dense<0.000000e+00> : vector<16xf32>
    %204 = vector.multi_reduction <add>, %201, %cst_80 [1] : vector<16x32xf32> to vector<16xf32>
    %205 = vector.shape_cast %204 : vector<16xf32> to vector<16x1xf32>
    %cst_81 = arith.constant 3.200000e+01 : f32
    %206 = vector.broadcast %cst_81 : f32 to vector<16x1xf32>
    %207 = arith.divf %205, %206 : vector<16x1xf32>
    %208 = arith.mulf %201, %201 : vector<16x32xf32>
    %cst_82 = arith.constant dense<0.000000e+00> : vector<16xf32>
    %209 = vector.multi_reduction <add>, %208, %cst_82 [1] : vector<16x32xf32> to vector<16xf32>
    %210 = vector.shape_cast %209 : vector<16xf32> to vector<16x1xf32>
    %cst_83 = arith.constant 3.200000e+01 : f32
    %211 = vector.broadcast %cst_83 : f32 to vector<16x1xf32>
    %212 = arith.divf %210, %211 : vector<16x1xf32>
    %213 = arith.mulf %207, %207 : vector<16x1xf32>
    %214 = arith.subf %212, %213 : vector<16x1xf32>
    %cst_84 = arith.constant 0.000000e+00 : f32
    %215 = vector.broadcast %cst_84 : f32 to vector<16x1xf32>
    %216 = arith.maximumf %214, %215 : vector<16x1xf32>
    %217 = vector.broadcast %207 : vector<16x1xf32> to vector<16x32xf32>
    %218 = arith.subf %201, %217 : vector<16x32xf32>
    %cst_85 = arith.constant 9.99999996E-13 : f32
    %219 = vector.broadcast %cst_85 : f32 to vector<16x1xf32>
    %220 = arith.addf %216, %219 : vector<16x1xf32>
    %221 = math.rsqrt %220 : vector<16x1xf32>
    %222 = vector.broadcast %221 : vector<16x1xf32> to vector<16x32xf32>
    %223 = arith.mulf %218, %222 : vector<16x32xf32>
    %224 = vector.broadcast %202 : vector<1x32xf32> to vector<16x32xf32>
    %225 = arith.mulf %223, %224 : vector<16x32xf32>
    %226 = vector.broadcast %203 : vector<1x32xf32> to vector<16x32xf32>
    %227 = arith.addf %225, %226 : vector<16x32xf32>
    %228 = arith.truncf %227 : vector<16x32xf32> to vector<16x32xbf16>
    %c1_86 = arith.constant 1 : index
    %c0_87 = arith.constant 0 : index
    %c0_88 = arith.constant 0 : index
    %229 = vector.load %arg8[%c1_86, %c0_87, %c0_88] : memref<2x32x64xbf16, #tpu.memory_space<vmem>>, vector<1x32x64xbf16>
    %230 = vector.shape_cast %229 : vector<1x32x64xbf16> to vector<32x64xbf16>
    %cst_89 = arith.constant dense<0.000000e+00> : vector<16x64xf32>
    %231 = tpu.matmul %228, %230, %cst_89 {dimension_numbers = #tpu.dot_dimension_numbers<[1], [0], [0], [1], [0, 0, 1, 1], [], []>} : vector<16x32xbf16>, vector<32x64xbf16>, vector<16x64xf32> -> vector<16x64xf32>
    %c1_90 = arith.constant 1 : index
    %c0_91 = arith.constant 0 : index
    %c0_92 = arith.constant 0 : index
    %232 = vector.load %arg9[%c1_90, %c0_91, %c0_92] : memref<2x1x64xf32, #tpu.memory_space<vmem>>, vector<1x1x64xf32>
    %233 = vector.shape_cast %232 : vector<1x1x64xf32> to vector<1x64xf32>
    %234 = vector.broadcast %233 : vector<1x64xf32> to vector<16x64xf32>
    %235 = arith.addf %231, %234 : vector<16x64xf32>
    %236 = arith.mulf %235, %235 : vector<16x64xf32>
    %237 = arith.mulf %235, %236 : vector<16x64xf32>
    %cst_93 = arith.constant 4.471500e-02 : f32
    %238 = vector.broadcast %cst_93 : f32 to vector<16x64xf32>
    %239 = arith.mulf %238, %237 : vector<16x64xf32>
    %240 = arith.addf %235, %239 : vector<16x64xf32>
    %cst_94 = arith.constant 0.797884583 : f32
    %241 = vector.broadcast %cst_94 : f32 to vector<16x64xf32>
    %242 = arith.mulf %241, %240 : vector<16x64xf32>
    %243 = math.tanh %242 : vector<16x64xf32>
    %cst_95 = arith.constant 1.000000e+00 : f32
    %244 = vector.broadcast %cst_95 : f32 to vector<16x64xf32>
    %245 = arith.addf %244, %243 : vector<16x64xf32>
    %cst_96 = arith.constant 5.000000e-01 : f32
    %246 = vector.broadcast %cst_96 : f32 to vector<16x64xf32>
    %247 = arith.mulf %246, %245 : vector<16x64xf32>
    %248 = arith.mulf %235, %247 : vector<16x64xf32>
    %249 = arith.truncf %248 : vector<16x64xf32> to vector<16x64xbf16>
    %c1_97 = arith.constant 1 : index
    %c0_98 = arith.constant 0 : index
    %c0_99 = arith.constant 0 : index
    %250 = vector.load %arg10[%c1_97, %c0_98, %c0_99] : memref<2x64x32xbf16, #tpu.memory_space<vmem>>, vector<1x64x32xbf16>
    %251 = vector.shape_cast %250 : vector<1x64x32xbf16> to vector<64x32xbf16>
    %cst_100 = arith.constant dense<0.000000e+00> : vector<16x32xf32>
    %252 = tpu.matmul %249, %251, %cst_100 {dimension_numbers = #tpu.dot_dimension_numbers<[1], [0], [0], [1], [0, 0, 1, 1], [], []>} : vector<16x64xbf16>, vector<64x32xbf16>, vector<16x32xf32> -> vector<16x32xf32>
    %253 = vector.extract_strided_slice %163 {offsets = [3, 0], sizes = [1, 32], strides = [1, 1]} : vector<6x32xf32> to vector<1x32xf32>
    %254 = vector.broadcast %253 : vector<1x32xf32> to vector<16x32xf32>
    %255 = arith.addf %252, %254 : vector<16x32xf32>
    %256 = arith.addf %227, %255 : vector<16x32xf32>
    %257 = vector.extract_strided_slice %163 {offsets = [4, 0], sizes = [1, 32], strides = [1, 1]} : vector<6x32xf32> to vector<1x32xf32>
    %258 = vector.extract_strided_slice %163 {offsets = [5, 0], sizes = [1, 32], strides = [1, 1]} : vector<6x32xf32> to vector<1x32xf32>
    %cst_101 = arith.constant dense<0.000000e+00> : vector<16xf32>
    %259 = vector.multi_reduction <add>, %256, %cst_101 [1] : vector<16x32xf32> to vector<16xf32>
    %260 = vector.shape_cast %259 : vector<16xf32> to vector<16x1xf32>
    %cst_102 = arith.constant 3.200000e+01 : f32
    %261 = vector.broadcast %cst_102 : f32 to vector<16x1xf32>
    %262 = arith.divf %260, %261 : vector<16x1xf32>
    %263 = arith.mulf %256, %256 : vector<16x32xf32>
    %cst_103 = arith.constant dense<0.000000e+00> : vector<16xf32>
    %264 = vector.multi_reduction <add>, %263, %cst_103 [1] : vector<16x32xf32> to vector<16xf32>
    %265 = vector.shape_cast %264 : vector<16xf32> to vector<16x1xf32>
    %cst_104 = arith.constant 3.200000e+01 : f32
    %266 = vector.broadcast %cst_104 : f32 to vector<16x1xf32>
    %267 = arith.divf %265, %266 : vector<16x1xf32>
    %268 = arith.mulf %262, %262 : vector<16x1xf32>
    %269 = arith.subf %267, %268 : vector<16x1xf32>
    %cst_105 = arith.constant 0.000000e+00 : f32
    %270 = vector.broadcast %cst_105 : f32 to vector<16x1xf32>
    %271 = arith.maximumf %269, %270 : vector<16x1xf32>
    %272 = vector.broadcast %262 : vector<16x1xf32> to vector<16x32xf32>
    %273 = arith.subf %256, %272 : vector<16x32xf32>
    %cst_106 = arith.constant 9.99999996E-13 : f32
    %274 = vector.broadcast %cst_106 : f32 to vector<16x1xf32>
    %275 = arith.addf %271, %274 : vector<16x1xf32>
    %276 = math.rsqrt %275 : vector<16x1xf32>
    %277 = vector.broadcast %276 : vector<16x1xf32> to vector<16x32xf32>
    %278 = arith.mulf %273, %277 : vector<16x32xf32>
    %279 = vector.broadcast %257 : vector<1x32xf32> to vector<16x32xf32>
    %280 = arith.mulf %278, %279 : vector<16x32xf32>
    %281 = vector.broadcast %258 : vector<1x32xf32> to vector<16x32xf32>
    %282 = arith.addf %280, %281 : vector<16x32xf32>
    %283 = vector.shape_cast %282 : vector<16x32xf32> to vector<2x8x32xf32>
    %284 = vector.extract_strided_slice %283 {offsets = [0, 0, 0], sizes = [2, 1, 32], strides = [1, 1, 1]} : vector<2x8x32xf32> to vector<2x1x32xf32>
    %285 = vector.shape_cast %284 : vector<2x1x32xf32> to vector<2x32xf32>
    %286 = arith.truncf %285 : vector<2x32xf32> to vector<2x32xbf16>
    %c0_107 = arith.constant 0 : index
    %c0_108 = arith.constant 0 : index
    %287 = vector.load %arg12[%c0_107, %c0_108] : memref<32x32xbf16, #tpu.memory_space<vmem>>, vector<32x32xbf16>
    %cst_109 = arith.constant dense<0.000000e+00> : vector<2x32xf32>
    %288 = tpu.matmul %286, %287, %cst_109 {dimension_numbers = #tpu.dot_dimension_numbers<[1], [0], [0], [1], [0, 0, 1, 1], [], []>} : vector<2x32xbf16>, vector<32x32xbf16>, vector<2x32xf32> -> vector<2x32xf32>
    %289 = vector.extract_strided_slice %2 {offsets = [2, 0], sizes = [1, 32], strides = [1, 1]} : vector<3x32xf32> to vector<1x32xf32>
    %290 = vector.broadcast %289 : vector<1x32xf32> to vector<2x32xf32>
    %291 = arith.addf %288, %290 : vector<2x32xf32>
    %292 = math.tanh %291 : vector<2x32xf32>
    %293 = arith.truncf %292 : vector<2x32xf32> to vector<2x32xbf16>
    %c0_110 = arith.constant 0 : index
    %c0_111 = arith.constant 0 : index
    %294 = vector.load %arg13[%c0_110, %c0_111] : memref<32x128xbf16, #tpu.memory_space<vmem>>, vector<32x128xbf16>
    %cst_112 = arith.constant dense<0.000000e+00> : vector<2x128xf32>
    %295 = tpu.matmul %293, %294, %cst_112 {dimension_numbers = #tpu.dot_dimension_numbers<[1], [0], [0], [1], [0, 0, 1, 1], [], []>} : vector<2x32xbf16>, vector<32x128xbf16>, vector<2x128xf32> -> vector<2x128xf32>
    %c0_113 = arith.constant 0 : index
    %c0_114 = arith.constant 0 : index
    %296 = vector.load %arg15[%c0_113, %c0_114] : memref<1x128xf32, #tpu.memory_space<vmem>>, vector<1x128xf32>
    %297 = vector.broadcast %296 : vector<1x128xf32> to vector<2x128xf32>
    %298 = arith.addf %295, %297 : vector<2x128xf32>
    %c0_115 = arith.constant 0 : index
    %c0_116 = arith.constant 0 : index
    %c0_117 = arith.constant 0 : index
    %299 = vector.load %arg16[%c0_115, %c0_116, %c0_117] : memref<1x2x128xf32, #tpu.memory_space<vmem>>, vector<1x2x128xf32>
    %300 = vector.shape_cast %299 : vector<1x2x128xf32> to vector<2x128xf32>
    %301 = vector.shape_cast %298 : vector<2x128xf32> to vector<1x2x128xf32>
    tpu.vector_store %arg16[%c0_115, %c0_116, %c0_117], %301 {strides = array<i32>} : memref<1x2x128xf32, #tpu.memory_space<vmem>>, vector<1x2x128xf32>,
    return
  }
  func.func @transform_0(%arg0: i32) -> (i32, i32, i32) {
    %c0_i32 = arith.constant 0 : i32
    %c0_i32_0 = arith.constant 0 : i32
    %c0_i32_1 = arith.constant 0 : i32
    return %arg0, %c0_i32, %c0_i32_0 : i32, i32, i32
  }
  func.func @transform_1(%arg0: i32) -> (i32, i32, i32) {
    %c0_i32 = arith.constant 0 : i32
    %c0_i32_0 = arith.constant 0 : i32
    %c0_i32_1 = arith.constant 0 : i32
    return %arg0, %c0_i32, %c0_i32_0 : i32, i32, i32
  }
  func.func @transform_2(%arg0: i32) -> (i32, i32) {
    %c0_i32 = arith.constant 0 : i32
    %c0_i32_0 = arith.constant 0 : i32
    %c0_i32_1 = arith.constant 0 : i32
    return %c0_i32, %c0_i32_0 : i32, i32
  }
  func.func @transform_3(%arg0: i32) -> (i32, i32) {
    %c0_i32 = arith.constant 0 : i32
    %c0_i32_0 = arith.constant 0 : i32
    %c0_i32_1 = arith.constant 0 : i32
    return %c0_i32, %c0_i32_0 : i32, i32
  }
  func.func @transform_4(%arg0: i32) -> (i32, i32, i32) {
    %c0_i32 = arith.constant 0 : i32
    %c0_i32_0 = arith.constant 0 : i32
    %c0_i32_1 = arith.constant 0 : i32
    %c0_i32_2 = arith.constant 0 : i32
    return %c0_i32, %c0_i32_0, %c0_i32_1 : i32, i32, i32
  }
  func.func @transform_5(%arg0: i32) -> (i32, i32, i32) {
    %c0_i32 = arith.constant 0 : i32
    %c0_i32_0 = arith.constant 0 : i32
    %c0_i32_1 = arith.constant 0 : i32
    %c0_i32_2 = arith.constant 0 : i32
    return %c0_i32, %c0_i32_0, %c0_i32_1 : i32, i32, i32
  }
  func.func @transform_6(%arg0: i32) -> (i32, i32, i32) {
    %c0_i32 = arith.constant 0 : i32
    %c0_i32_0 = arith.constant 0 : i32
    %c0_i32_1 = arith.constant 0 : i32
    %c0_i32_2 = arith.constant 0 : i32
    return %c0_i32, %c0_i32_0, %c0_i32_1 : i32, i32, i32
  }
  func.func @transform_7(%arg0: i32) -> (i32, i32, i32) {
    %c0_i32 = arith.constant 0 : i32
    %c0_i32_0 = arith.constant 0 : i32
    %c0_i32_1 = arith.constant 0 : i32
    %c0_i32_2 = arith.constant 0 : i32
    return %c0_i32, %c0_i32_0, %c0_i32_1 : i32, i32, i32
  }
  func.func @transform_8(%arg0: i32) -> (i32, i32, i32) {
    %c0_i32 = arith.constant 0 : i32
    %c0_i32_0 = arith.constant 0 : i32
    %c0_i32_1 = arith.constant 0 : i32
    %c0_i32_2 = arith.constant 0 : i32
    return %c0_i32, %c0_i32_0, %c0_i32_1 : i32, i32, i32
  }
  func.func @transform_9(%arg0: i32) -> (i32, i32, i32) {
    %c0_i32 = arith.constant 0 : i32
    %c0_i32_0 = arith.constant 0 : i32
    %c0_i32_1 = arith.constant 0 : i32
    %c0_i32_2 = arith.constant 0 : i32
    return %c0_i32, %c0_i32_0, %c0_i32_1 : i32, i32, i32
  }
  func.func @transform_10(%arg0: i32) -> (i32, i32, i32) {
    %c0_i32 = arith.constant 0 : i32
    %c0_i32_0 = arith.constant 0 : i32
    %c0_i32_1 = arith.constant 0 : i32
    %c0_i32_2 = arith.constant 0 : i32
    return %c0_i32, %c0_i32_0, %c0_i32_1 : i32, i32, i32
  }
  func.func @transform_11(%arg0: i32) -> (i32, i32) {
    %c0_i32 = arith.constant 0 : i32
    %c0_i32_0 = arith.constant 0 : i32
    %c0_i32_1 = arith.constant 0 : i32
    return %c0_i32, %c0_i32_0 : i32, i32
  }
  func.func @transform_12(%arg0: i32) -> (i32, i32) {
    %c0_i32 = arith.constant 0 : i32
    %c0_i32_0 = arith.constant 0 : i32
    %c0_i32_1 = arith.constant 0 : i32
    return %c0_i32, %c0_i32_0 : i32, i32
  }
  func.func @transform_13(%arg0: i32) -> (i32, i32) {
    %c0_i32 = arith.constant 0 : i32
    %c0_i32_0 = arith.constant 0 : i32
    %c0_i32_1 = arith.constant 0 : i32
    return %c0_i32, %c0_i32_0 : i32, i32
  }
  func.func @transform_14(%arg0: i32) -> (i32, i32) {
    %c0_i32 = arith.constant 0 : i32
    %c0_i32_0 = arith.constant 0 : i32
    %c0_i32_1 = arith.constant 0 : i32
    return %c0_i32, %c0_i32_0 : i32, i32
  }
  func.func @transform_15(%arg0: i32) -> (i32, i32, i32) {
    %c0_i32 = arith.constant 0 : i32
    %c0_i32_0 = arith.constant 0 : i32
    %c0_i32_1 = arith.constant 0 : i32
    return %arg0, %c0_i32, %c0_i32_0 : i32, i32, i32
  }
}

</mosaic_0001>

<bundles_post_ra>
// kernel: tpu_custom_call.1
= control target key start
LH: loop header
LB: loop body
LE: loop exit
PB: predicated region body
PF: predicated region fallthrough
CT: control target
= control target key end

     0   :  { %20 = vsyncpa [#allocation3], 0  ;;  %s5609_s0 = inlined_call_operand.hbm [shape: f32[1,16,32], index: 0, kind: input, shape index: {}]   ;;  %s5610_s1 = inlined_call_operand.hbm [shape: f32[1,1,16], index: 1, kind: input, shape index: {}]   ;;  %s5611_s2 = inlined_call_operand.hbm [shape: f32[16,32], index: 2, kind: input, shape index: {}]   ;;  %s5612_s3 = inlined_call_operand.hbm [shape: f32[16,16], index: 3, kind: input, shape index: {}]   ;;  %s5613_s4 = inlined_call_operand.vmem [shape: bf16[2,32,96], index: 4, kind: input, shape index: {}]   ;;  %s5614_s5 = inlined_call_operand.hbm [shape: f32[2,1,96], index: 5, kind: input, shape index: {}]   ;;  %s5615_s6 = inlined_call_operand.vmem [shape: bf16[2,32,32], index: 6, kind: input, shape index: {}]   ;;  %s5616_s7 = inlined_call_operand.vmem [shape: bf16[2,32,64], index: 7, kind: input, shape index: {}]   ;;  %s5617_s8 = inlined_call_operand.hbm [shape: f32[2,1,64], index: 8, kind: input, shape index: {}]   ;;  %s5618_s9 = inlined_call_operand.vmem [shape: bf16[2,64,32], index: 9, kind: input, shape index: {}]   ;;  %s5619_s10 = inlined_call_operand.vmem [shape: f32[2,6,32], index: 10, kind: input, shape index: {}]   ;;  %s5620_s11 = inlined_call_operand.vmem [shape: bf16[32,32], index: 11, kind: input, shape index: {}]   ;;  %s5621_s12 = inlined_call_operand.hbm [shape: bf16[32,128], index: 12, kind: input, shape index: {}]   ;;  %s5622_s13 = inlined_call_operand.hbm [shape: f32[3,32], index: 13, kind: input, shape index: {}]   ;;  %s5623_s14 = inlined_call_operand.vmem [shape: f32[1,128], index: 14, kind: input, shape index: {}]   ;;  %s5624_s15 = inlined_call_operand.hbm [shape: f32[1,2,128], index: 15, kind: output, shape index: {}]  }
   0x1   :  { %21 = vsyncpa [#allocation6], 0 }
   0x2   :  { %22 = vsyncpa [#allocation9], 0 }
   0x3   :  { %23 = vsyncpa [#allocation12], 0 }
   0x4   :  { %24 = vsyncpa [#allocation15], 0 }
   0x5   :  { %25 = vsyncpa [#allocation4], 0  ;;  %s4856_s18 = smov [#allocation5]  }
   0x6   :  { %s44_s19 = sshll.u32 %s4856_s18, 4  ;;  %s45_s19 = int_to_ptr.vmem [resolvable:$true] %s44_s19 }
   0x7   :  { %s4672_s20 = scalar_lea.vmem %s45_s19, 16  ;;  %s4676_s21 = scalar_lea.vmem %s45_s19, 32 }
   0x8   :  { %p4673_p0 = scmp.ne.s32.totalorder %s45_s19, %s4672_s20  ;;  %p4677_p1 = scmp.lt.s32.totalorder %s45_s19, %s45_s19 }
   0x9   :  { %p4678_p2 = scmp.lt.s32.totalorder %s4676_s21, %s4672_s20 }
   0xb   :  { %p4679_p3 = por %p4678_p2, %p4677_p1 }
   0xd   :  { %p4680_p4 = pnand %p4679_p3, %p4673_p0 }
   0xf   :  { %4683 = shalt.err (!%p4680_p4)
}
  0x10   :  { %47 = dma.hbm_to_vmem [thread:$0]  %s5610_s1, 16, %s45_s19, [#allocation6]  }
  0x11   :  { %s4857_s24 = smov [#allocation8]  }
  0x12   :  { %s65_s25 = sshll.u32 %s4857_s24, 4  ;;  %s66_s25 = int_to_ptr.vmem [resolvable:$true] %s65_s25 }
  0x13   :  { %s4692_s26 = scalar_lea.vmem %s66_s25, 256  ;;  %p4697_p6 = scmp.lt.s32.totalorder %s66_s25, %s66_s25 }
  0x14   :  { %p4693_p5 = scmp.ne.s32.totalorder %s66_s25, %s4692_s26  ;;  %p4698_p7 = scmp.lt.s32.totalorder %s4692_s26, %s4692_s26 }
  0x16   :  { %p4699_p8 = por %p4698_p7, %p4697_p6 }
  0x18   :  { %p4700_p9 = pnand %p4699_p8, %p4693_p5 }
  0x1a   :  { %4703 = shalt.err (!%p4700_p9)
}
  0x1b   :  { %s4858_s27 = smov 128   ;;  %s4859_s28 = smov 8  }
  0x1c   :  { %71 = dma.hbm_to_vmem [thread:$0]  %s5612_s3, 256, %s66_s25, [#allocation9], %s4858_s27, %s4858_s27, %s4859_s28  }
  0x1d   :  { %s4860_s1 = smov [#allocation11]   ;;  %s4861_s17 = smov [#allocation2]  }
  0x1e   :  { %s95_s16 = sshll.u32 %s4860_s1, 4  ;;  %s31_s18 = sshll.u32 %s4861_s17, 4  ;;  %s96_s16 = int_to_ptr.vmem [resolvable:$true] %s95_s16  ;;  %s32_s18 = int_to_ptr.vmem [resolvable:$true] %s31_s18 }
  0x1f   :  { %s4712_s19 = scalar_lea.vmem %s96_s16, 32  ;;  %p4717_p11 = scmp.lt.s32.totalorder %s96_s16, %s96_s16 }
  0x20   :  { %p4713_p10 = scmp.ne.s32.totalorder %s96_s16, %s4712_s19  ;;  %p4718_p12 = scmp.lt.s32.totalorder %s4712_s19, %s4712_s19 }
  0x22   :  { %p4719_p13 = por %p4718_p12, %p4717_p11 }
  0x24   :  { %p4720_p0 = pnand %p4719_p13, %p4713_p10 }
  0x26   :  { %4723 = shalt.err (!%p4720_p0)
}
  0x27   :  { %s4862_s20 = smov 16   ;;  %s4863_s21 = smov 1  }
  0x28   :  { %101 = dma.hbm_to_vmem [thread:$0]  %s5617_s8, 32, %s96_s16, [#allocation12], %s4862_s20, %s4862_s20, %s4863_s21  }
  0x29   :  { %s4732_s23 = scalar_lea.vmem %s32_s18, 256  ;;  %p4737_p2 = scmp.lt.s32.totalorder %s32_s18, %s32_s18 }
  0x2a   :  { %p4733_p1 = scmp.ne.s32.totalorder %s32_s18, %s4732_s23  ;;  %p4738_p3 = scmp.lt.s32.totalorder %s4732_s23, %s4732_s23 }
  0x2c   :  { %p4739_p4 = por %p4738_p3, %p4737_p2 }
  0x2e   :  { %p4740_p5 = pnand %p4739_p4, %p4733_p1 }
  0x30   :  { %4743 = shalt.err (!%p4740_p5)
}
  0x31   :  { %37 = dma.hbm_to_vmem [thread:$0]  %s5609_s0, 256, %s32_s18, [#allocation3], %s4858_s27, %s4858_s27, %s4859_s28  }
  0x32   :  { %s4864_s26 = smov [#allocation7]   ;;  %s4865_s30 = smov [#allocation10]  }
  0x33   :  { %s53_s29 = sshll.u32 %s4864_s26, 4  ;;  %s79_s1 = sshll.u32 %s4865_s30, 4  ;;  %s54_s29 = int_to_ptr.vmem [resolvable:$true] %s53_s29  ;;  %s80_s1 = int_to_ptr.vmem [resolvable:$true] %s79_s1 }
  0x34   :  { %s4752_s8 = scalar_lea.vmem %s54_s29, 256  ;;  %p4757_p7 = scmp.lt.s32.totalorder %s54_s29, %s54_s29 }
  0x35   :  { %p4753_p6 = scmp.ne.s32.totalorder %s54_s29, %s4752_s8  ;;  %p4758_p8 = scmp.lt.s32.totalorder %s4752_s8, %s4752_s8 }
  0x37   :  { %p4759_p9 = por %p4758_p8, %p4757_p7 }
  0x39   :  { %p4760_p10 = pnand %p4759_p9, %p4753_p6 }
  0x3b   :  { %4763 = shalt.err (!%p4760_p10)
}
  0x3c   :  { %59 = dma.hbm_to_vmem [thread:$0]  %s5611_s2, 256, %s54_s29, [#allocation6], %s4858_s27, %s4858_s27, %s4859_s28  }
  0x3d   :  { %s4772_s0 = scalar_lea.vmem %s80_s1, 32  ;;  %p4777_p12 = scmp.lt.s32.totalorder %s80_s1, %s80_s1 }
  0x3e   :  { %p4773_p11 = scmp.ne.s32.totalorder %s80_s1, %s4772_s0  ;;  %p4778_p13 = scmp.lt.s32.totalorder %s4772_s0, %s4772_s0 }
  0x40   :  { %p4779_p0 = por %p4778_p13, %p4777_p12 }
  0x42   :  { %p4780_p1 = pnand %p4779_p0, %p4773_p11 }
  0x44   :  { %4783 = shalt.err (!%p4780_p1)
}
  0x45   :  { %85 = dma.hbm_to_vmem [thread:$0]  %s5614_s5, 32, %s80_s1, [#allocation9], %s4862_s20, %s4862_s20, %s4863_s21  }
  0x46   :  { %s4866_s22 = smov [#allocation13]  }
  0x47   :  { %s113_s3 = sshll.u32 %s4866_s22, 4  ;;  %s114_s3 = int_to_ptr.vmem [resolvable:$true] %s113_s3 }
  0x48   :  { %s4792_s23 = scalar_lea.vmem %s114_s3, 256  ;;  %p4797_p3 = scmp.lt.s32.totalorder %s114_s3, %s114_s3 }
  0x49   :  { %p4793_p2 = scmp.ne.s32.totalorder %s114_s3, %s4792_s23  ;;  %p4798_p4 = scmp.lt.s32.totalorder %s4792_s23, %s4792_s23 }
  0x4b   :  { %p4799_p5 = por %p4798_p4, %p4797_p3 }
  0x4d   :  { %p4800_p6 = pnand %p4799_p5, %p4793_p2 }
  0x4f   :  { %4803 = shalt.err (!%p4800_p6)
}
  0x50   :  { %s4867_s2 = smov 64   ;;  %s4868_s27 = smov 4  }
  0x51   :  { %119 = dma.hbm_to_vmem [thread:$0]  %s5621_s12, 256, %s114_s3, [#allocation12], %s4867_s2, %s4867_s2, %s4868_s27  }
  0x52   :  { %s4869_s26 = smov [#allocation14]  }
  0x53   :  { %s126_s5 = sshll.u32 %s4869_s26, 4  ;;  %s127_s5 = int_to_ptr.vmem [resolvable:$true] %s126_s5 }
  0x54   :  { %s4812_s21 = scalar_lea.vmem %s127_s5, 64  ;;  %p4817_p8 = scmp.lt.s32.totalorder %s127_s5, %s127_s5 }
  0x55   :  { %p4813_p7 = scmp.ne.s32.totalorder %s127_s5, %s4812_s21  ;;  %p4818_p9 = scmp.lt.s32.totalorder %s4812_s21, %s4812_s21 }
  0x57   :  { %p4819_p10 = por %p4818_p9, %p4817_p8 }
  0x59   :  { %p4820_p11 = pnand %p4819_p10, %p4813_p7 }
  0x5b   :  { %4823 = shalt.err (!%p4820_p11)
}
  0x5c   :  { %129 = dma.hbm_to_vmem [thread:$0]  %s5622_s13, 64, %s127_s5, [#allocation15]  }
  0x5d   :  { %4844 = dma.done.wait [#allocation3], 256  }
  0x5e   :  { %4845 = vsyncadd [#allocation3], 4294967040 }
  0x5f   :  { %4846 = dma.done.wait [#allocation6], 272  }
  0x60   :  { %4847 = vsyncadd [#allocation6], 4294967024 }
  0x61   :  { %4848 = dma.done.wait [#allocation9], 288  }
  0x62   :  { %4849 = vsyncadd [#allocation9], 4294967008 }
  0x63   :  { %4850 = dma.done.wait [#allocation12], 288  }
  0x64   :  { %4851 = vsyncadd [#allocation12], 4294967008 }
  0x65   :  { %4852 = dma.done.wait [#allocation15], 64  }
  0x66   :  { %4853 = vsyncadd [#allocation15], 4294967232  ;;  %v157_v0 = vld [vmem:[#allocation2] sm:$0xff]  ;;  %v160_v1 = vld [vmem:[#allocation7] sm:$0xff]  ;;  %vm164_vm0 = vcmask 261120   ;;  %v4870_v13 = vmov 0.0   ;;  %v198_v31 = vlaneseq }
  0x67   :  { %v158_v2 = vld [vmem:[#allocation2 + $0x8] sm:$0xff]  ;;  %v162_v3 = vadd.f32 %v160_v1, %v157_v0  ;;  %v161_v4 = vld [vmem:[#allocation7 + $0x8] sm:$0xff]  ;;  %4307 = vmatprep.subr.bf16.mxu0 %v4870_v13  ;;  %vm4871_vm1 = vmmov 0   ;;  %v4117_v49 = vld [vmem:[#allocation10] ss:$0 sm:$0xff]  ;;  %vm458_vm2 = vcmask 64512  }
  0x68   :  { %v163_v5 = vadd.f32 %v161_v4, %v158_v2  ;;  %v4545_v12 = vld [vmem:[%s5613_s4 + $0x8] sm:$0xff]   ;;  %4311 = vmatprep.mubr.msk.bf16.mxu0 %vm4871_vm1, %v4870_v13  ;;  %v4546_v14 = vld [vmem:[%s5613_s4] sm:$0xff]   ;;  %v5016_v32 = vshrl.u32 %v198_v31, 7  ;;  %s4872_s16 = smov 112   ;;  %s4873_s17 = smov 120   ;;  %vm775_vm3 = vcmask 130048  }
  0x69   :  { %v165_v6 = vsel %vm164_vm0, %v162_v3, 0.0  ;;  %v174_v7 = vmul.f32 %v162_v3, %v162_v3  ;;  %4308 = vmatpush3.bf16.msra.mxu0 %v4545_v12  ;;  %v159_v34 = vld [vmem:[#allocation14] sm:$0x7]  ;;  %s4874_s0 = smov 104   ;;  %s4875_s18 = smov 96   ;;  %vm1760_vm4 = vcmask 195584  }
  0x6a   :  { %166 = vadd.xlane.f32.xlu0 %v165_v6  ;;  %v175_v8 = vmul.f32 %v163_v5, %v163_v5  ;;  %v168_v10 = vsel %vm164_vm0, %v163_v5, 0.0  ;;  %4309 = vmatprep.subr.bf16.mxu0 %v4870_v13  ;;  %v5019_v33 = vsub.s32 0, %v5016_v32  ;;  %v5023_v39 = vsub.s32 1, %v5016_v32  ;;  %s4878_s27 = smov 24   ;;  %s4879_s3 = smov [#allocation16]  }
  0x6b   :  { %v176_v9 = vsel %vm164_vm0, %v174_v7, 0.0  ;;  %vm1997_vm5 = vcmask 523264   ;;  %vm3971_vm6 = vcmask 1041409   ;;  %s4104_s23 = sshll.u32 %s4879_s3, 4  ;;  %s4105_s23 = int_to_ptr.vmem [resolvable:$true] %s4104_s23 }
  0x6c   :  { %177 = vadd.xlane.f32.xlu1 %v176_v9  ;;  %v179_v11 = vsel %vm164_vm0, %v175_v8, 0.0  ;;  %v201_v38 = vrot.slane %v159_v34, %v5019_v33  ;;  %v207_v44 = vrot.slane %v159_v34, %v5023_v39  ;;  %s4824_s24 = scalar_lea.vmem %s4105_s23, 32  ;;  %p4829_p13 = scmp.lt.s32.totalorder %s4105_s23, %s4105_s23 }
  0x6d   :  { %4310 = vmatpush3.bf16.msra.mxu0 %v4546_v14  ;;  %p4825_p12 = scmp.ne.s32.totalorder %s4105_s23, %s4824_s24  ;;  %p4830_p0 = scmp.lt.s32.totalorder %s4824_s24, %s4824_s24 }
  0x6e   :  { %169 = vadd.xlane.f32.xlu0 %v168_v10  ;;  %4335 = vmatprep.subr.mxu0 %v4870_v13  ;;  %v210_v10 = vld [vmem:[#allocation5] sm:$0x1] }
  0x6f   :  { %p4831_p1 = por %p4830_p0, %p4829_p13 }
  0x70   :  { %180 = vadd.xlane.f32.xlu1 %v179_v11  ;;  %v213_v11 = vsub.f32 1.0, %v210_v10 }
  0x71   :  { %p4832_p2 = pnand %p4831_p1, %p4825_p12 }
  0x72   :  { %v214_v12 = vmul.f32 -1e+09, %v213_v11 }
  0x74   :  { %v219_v14 = vrot.slane %v214_v12, %v5019_v33 }
  0xf3   :  { %v167_v15 = vpop.xlane.xlu0 %166 }
  0xf4   :  { %v172_v16 = vmul.f32 0.03125, %v167_v15  ;;  %v212_v15 = vld [vmem:[#allocation8 + $0x8] sm:$0xff] }
  0xf5   :  { %v178_v17 = vpop.xlane.xlu1 %177 }
  0xf6   :  { %v184_v18 = vmul.f32 %v172_v16, %v172_v16  ;;  %v182_v19 = vmul.f32 0.03125, %v178_v17  ;;  %v190_v35 = vsub.f32 %v162_v3, %v172_v16  ;;  %v211_v16 = vld [vmem:[#allocation8] sm:$0xff]  ;;  %v5099_v17 = vadd.f32 %v219_v14, %v212_v15 }
  0xf7   :  { %v170_v20 = vpop.xlane.xlu0 %169 }
  0xf8   :  { %v186_v21 = vsub.f32 %v182_v19, %v184_v18  ;;  %v173_v22 = vmul.f32 0.03125, %v170_v20  ;;  %v5101_v18 = vadd.f32 %v219_v14, %v211_v16 }
  0xf9   :  { %v181_v23 = vpop.xlane.xlu1 %180 }
  0xfa   :  { %v188_v24 = vmax.f32 %v186_v21, 0.0  ;;  %v185_v25 = vmul.f32 %v173_v22, %v173_v22  ;;  %v183_v26 = vmul.f32 0.03125, %v181_v23  ;;  %v191_v40 = vsub.f32 %v163_v5, %v173_v22 }
  0xfc   :  { %v192_v27 = vadd.f32 1e-12, %v188_v24  ;;  %v187_v28 = vsub.f32 %v183_v26, %v185_v25 }
  0xfe   :  { %4569 = vrsqrt.f32 %v192_v27  ;;  %v189_v29 = vmax.f32 %v187_v28, 0.0 }
 0x100   :  { %v193_v30 = vadd.f32 1e-12, %v189_v29 }
 0x102   :  { %4571 = vrsqrt.f32 %v193_v30 }
 0x10b   :  { %v4570_v36 = vpop.eup %4569 }
 0x10c   :  { %v196_v37 = vmul.f32 %v4570_v36, %v190_v35 }
 0x10e   :  { %v202_v43 = vmul.f32 %v201_v38, %v196_v37 }
 0x10f   :  { %v4572_v41 = vpop.eup %4571 }
 0x110   :  { %v197_v42 = vmul.f32 %v4572_v41, %v191_v40  ;;  %v5026_v46 = vadd.f32 %v207_v44, %v202_v43 }
 0x112   :  { %v203_v45 = vmul.f32 %v201_v38, %v197_v42 }
 0x114   :  { %v5028_v47 = vadd.f32 %v207_v44, %v203_v45 }
 0x116   :  { %v224_v48 = vpack.c.bf16 %v5028_v47, %v5026_v46 }
 0x118   :  { %4312 = vmatmul.mubr.msk.bf16.vlgmr.msra.gmra.mxu0 %vm164_vm0, %v224_v48 }
 0x119   :  { %4339 = vmatprep.mubr.msk.f32.mxu0 %vm4871_vm1, %v4870_v13 }
 0x1d8   :  { %v285_v50 = vpop.f32.mrf.mxu0 }
 0x1d9   :  { %v5035_v51 = vadd.f32 %v4117_v49, %v285_v50 }
 0x1da   :  { %v4313_v52 = vpop.f32.mrf.mxu0 }
 0x1db   :  { %298 = vrot.lane.b32.xlu1 %v5035_v51, %s4872_s16  ;;  %294 = vrot.lane.b32.xlu0 %v5035_v51, %s4873_s17 }
 0x1dc   :  { %4317 = vmatprep.mubr.msk.f32.mxu1 %vm458_vm2, %v5035_v51  ;;  %v288_v53 = vpop.f32.mrf.mxu0 }
 0x1dd   :  { %v5043_v54 = vadd.f32 %v4117_v49, %v288_v53 }
 0x1de   :  { %v4314_v55 = vpop.f32.mrf.mxu0 }
 0x1df   :  { %302 = vrot.lane.b32.xlu0 %v5035_v51, %s4874_s0  ;;  %296 = vrot.lane.b32.xlu1 %v5043_v54, %s4873_s17 }
 0x1e3   :  { %306 = vrot.lane.b32.xlu0 %v5035_v51, %s4875_s18  ;;  %300 = vrot.lane.b32.xlu1 %v5043_v54, %s4872_s16 }
 0x1e7   :  { %304 = vrot.lane.b32.xlu1 %v5043_v54, %s4874_s0 }
 0x1eb   :  { %308 = vrot.lane.b32.xlu1 %v5043_v54, %s4875_s18 }
 0x24d   :  { %v5057_v56 = vpop.permute.xlu1 %298  ;;  %v5059_v57 = vpop.permute.xlu0 %294 }
 0x24e   :  { %310 = vrot.lane.b32.xlu0 %v5059_v57, %s4875_s18 }
 0x251   :  { %v5063_v58 = vpop.permute.xlu1 %296  ;;  %v5069_v59 = vpop.permute.xlu0 %302 }
 0x252   :  { %314 = vrot.lane.b32.xlu0 %v5057_v56, %s4875_s18  ;;  %312 = vrot.lane.b32.xlu1 %v5063_v58, %s4875_s18 }
 0x255   :  { %v5071_v60 = vpop.permute.xlu1 %300  ;;  %v307_v62 = vpop.permute.xlu0 %306 }
 0x256   :  { %318 = vrot.lane.b32.xlu0 %v5069_v59, %s4875_s18  ;;  %316 = vrot.lane.b32.xlu1 %v5071_v60, %s4875_s18 }
 0x259   :  { %v5077_v61 = vpop.permute.xlu1 %304 }
 0x25a   :  { %320 = vrot.lane.b32.xlu1 %v5077_v61, %s4875_s18 }
 0x25d   :  { %v309_v63 = vpop.permute.xlu1 %308 }
 0x274   :  { %330 = vxpose.xlu0.b32.start [1/2] (short) (narrow) %v307_v62, 8 }
 0x278   :  { %331 = vxpose.xlu0.b32.end [2/2] (short) (narrow) %v309_v63, 8 }
 0x2c0   :  { %v311_v0 = vpop.permute.xlu0 %310 }
 0x2c1   :  { %362 = vxpose.xlu1.b32.start [1/2] (short) (narrow) %v311_v0, 8 }
 0x2c4   :  { %v315_v1 = vpop.permute.xlu0 %314  ;;  %v313_v2 = vpop.permute.xlu1 %312 }
 0x2c5   :  { %394 = vxpose.xlu0.b32.start [1/2] (short) (narrow) %v315_v1, 8  ;;  %363 = vxpose.xlu1.b32.end [2/2] (short) (narrow) %v313_v2, 8 }
 0x2c8   :  { %v317_v3 = vpop.permute.xlu1 %316  ;;  %v319_v4 = vpop.permute.xlu0 %318 }
 0x2c9   :  { %395 = vxpose.xlu0.b32.end [2/2] (short) (narrow) %v317_v3, 8 }
 0x2cc   :  { %v321_v5 = vpop.permute.xlu1 %320 }
 0x2cd   :  { %426 = vxpose.xlu0.b32.start [1/2] (short) (narrow) %v319_v4, 8 }
 0x2d1   :  { %427 = vxpose.xlu0.b32.end [2/2] (short) (narrow) %v321_v5, 8 }
 0x2f0   :  { %v346_v6 = vpop.trf.xlu0 }
 0x2f1   :  { %4315 = vmatprep.subr.mxu1 %v346_v6 }
 0x2f2   :  { %4316 = vmatpush3.msra.mxu1 %v346_v6 }
 0x2f3   :  { %4318 = vmatmul.mubr.msk.f32.vlgmr.msra.gmra.mxu1 %vm458_vm2, %v5043_v54 }
 0x2f4   :  { %4322 = vmatprep.mubr.msk.f32.mxu1 %vm458_vm2, %v5059_v57 }
 0x33d   :  { %v378_v7 = vpop.trf.xlu1 }
 0x33e   :  { %4320 = vmatprep.subr.mxu1 %v378_v7 }
 0x33f   :  { %4321 = vmatpush3.msra.mxu1 %v378_v7 }
 0x340   :  { %4323 = vmatmul.mubr.msk.f32.vlgmr.msra.gmra.mxu1 %vm458_vm2, %v5063_v58 }
 0x341   :  { %v410_v8 = vpop.trf.xlu0  ;;  %4327 = vmatprep.mubr.msk.f32.mxu1 %vm458_vm2, %v5057_v56 }
 0x342   :  { %4325 = vmatprep.subr.mxu1 %v410_v8 }
 0x343   :  { %4326 = vmatpush3.msra.mxu1 %v410_v8 }
 0x344   :  { %4328 = vmatmul.mubr.msk.f32.vlgmr.msra.gmra.mxu1 %vm458_vm2, %v5071_v60 }
 0x345   :  { %4332 = vmatprep.mubr.msk.f32.mxu1 %vm458_vm2, %v5069_v59 }
 0x349   :  { %v442_v9 = vpop.trf.xlu0 }
 0x34a   :  { %4330 = vmatprep.subr.mxu1 %v442_v9 }
 0x34b   :  { %4331 = vmatpush3.msra.mxu1 %v442_v9 }
 0x34c   :  { %4333 = vmatmul.mubr.msk.f32.vlgmr.msra.gmra.mxu1 %vm458_vm2, %v5077_v61  ;;  %4342 = vmatprep.subr.mxu1 %v4870_v13 }
 0x34d   :  { %4346 = vmatprep.mubr.msk.f32.mxu1 %vm4871_vm1, %v4870_v13 }
 0x3b3   :  { %v4319_v19 = vpop.f32.mrf.mxu1 }
 0x3b4   :  { %v535_v20 = vadd.f32 %v4319_v19, %v5099_v17 }
 0x3b5   :  { %v529_v21 = vpop.f32.mrf.mxu1 }
 0x3b6   :  { %v530_v22 = vadd.f32 %v529_v21, %v5101_v18  ;;  %v779_v23 = vsel %vm775_vm3, %v535_v20, -inf }
 0x3b7   :  { %780 = vmax.xlane.f32.xlu1 %v779_v23 }
 0x3b8   :  { %v776_v24 = vsel %vm775_vm3, %v530_v22, -inf }
 0x3bb   :  { %777 = vmax.xlane.f32.xlu1 %v776_v24 }
 0x400   :  { %v4324_v25 = vpop.f32.mrf.mxu1 }
 0x401   :  { %v614_v26 = vadd.f32 %v4324_v25, %v5099_v17 }
 0x402   :  { %v608_v27 = vpop.f32.mrf.mxu1 }
 0x403   :  { %v609_v28 = vadd.f32 %v608_v27, %v5101_v18  ;;  %v785_v29 = vsel %vm775_vm3, %v614_v26, -inf }
 0x404   :  { %786 = vmax.xlane.f32.xlu0 %v785_v29  ;;  %v4329_v30 = vpop.f32.mrf.mxu1 }
 0x405   :  { %v693_v31 = vadd.f32 %v4329_v30, %v5099_v17  ;;  %v782_v34 = vsel %vm775_vm3, %v609_v28, -inf }
 0x406   :  { %v687_v35 = vpop.f32.mrf.mxu1  ;;  %783 = vmax.xlane.f32.xlu1 %v782_v34 }
 0x407   :  { %v688_v36 = vadd.f32 %v687_v35, %v5101_v18  ;;  %v791_v37 = vsel %vm775_vm3, %v693_v31, -inf }
 0x408   :  { %792 = vmax.xlane.f32.xlu0 %v791_v37 }
 0x409   :  { %v788_v38 = vsel %vm775_vm3, %v688_v36, -inf }
 0x40c   :  { %v4334_v40 = vpop.f32.mrf.mxu1  ;;  %789 = vmax.xlane.f32.xlu0 %v788_v38 }
 0x40d   :  { %v772_v41 = vadd.f32 %v4334_v40, %v5099_v17 }
 0x40e   :  { %v766_v42 = vpop.f32.mrf.mxu1 }
 0x40f   :  { %v767_v43 = vadd.f32 %v766_v42, %v5101_v18  ;;  %v797_v44 = vsel %vm775_vm3, %v772_v41, -inf }
 0x410   :  { %798 = vmax.xlane.f32.xlu1 %v797_v44 }
 0x411   :  { %v794_v45 = vsel %vm775_vm3, %v767_v43, -inf }
 0x414   :  { %795 = vmax.xlane.f32.xlu1 %v794_v45 }
 0x422   :  { %864 = vrot.lane.b32.xlu0 %v5035_v51, %s4867_s2 }
 0x425   :  { %868 = vrot.lane.b32.xlu1 %v5059_v57, %s4867_s2 }
 0x426   :  { %872 = vrot.lane.b32.xlu0 %v5057_v56, %s4867_s2 }
 0x429   :  { %866 = vrot.lane.b32.xlu1 %v5043_v54, %s4867_s2 }
 0x42d   :  { %870 = vrot.lane.b32.xlu1 %v5063_v58, %s4867_s2 }
 0x431   :  { %876 = vrot.lane.b32.xlu1 %v5069_v59, %s4867_s2 }
 0x435   :  { %874 = vrot.lane.b32.xlu1 %v5071_v60, %s4867_s2 }
 0x439   :  { %878 = vrot.lane.b32.xlu1 %v5077_v61, %s4867_s2 }
 0x440   :  { %v781_v48 = vpop.xlane.xlu1 %780 }
 0x441   :  { %v801_v49 = vsub.f32 %v535_v20, %v781_v48 }
 0x443   :  { %v810_v50 = vmul.f32 1.442695, %v801_v49 }
 0x444   :  { %v778_v51 = vpop.xlane.xlu1 %777 }
 0x445   :  { %4573 = vpow2.f32 %v810_v50  ;;  %v800_v52 = vsub.f32 %v530_v22, %v778_v51 }
 0x447   :  { %v808_v53 = vmul.f32 1.442695, %v800_v52 }
 0x449   :  { %4575 = vpow2.f32 %v808_v53 }
 0x452   :  { %v5135_v54 = vpop.eup %4573 }
 0x453   :  { %v827_v55 = vsel %vm775_vm3, %v5135_v54, 0.0 }
 0x454   :  { %828 = vadd.xlane.f32.xlu0 %v827_v55 }
 0x456   :  { %v5139_v56 = vpop.eup %4575 }
 0x457   :  { %v824_v57 = vsel %vm775_vm3, %v5139_v56, 0.0 }
 0x458   :  { %825 = vadd.xlane.f32.xlu0 %v824_v57 }
 0x48d   :  { %v787_v58 = vpop.xlane.xlu0 %786 }
 0x48e   :  { %v803_v59 = vsub.f32 %v614_v26, %v787_v58 }
 0x48f   :  { %v784_v60 = vpop.xlane.xlu1 %783 }
 0x490   :  { %v814_v61 = vmul.f32 1.442695, %v803_v59  ;;  %v802_v62 = vsub.f32 %v609_v28, %v784_v60 }
 0x491   :  { %v793_v63 = vpop.xlane.xlu0 %792 }
 0x492   :  { %4577 = vpow2.f32 %v814_v61  ;;  %v812_v0 = vmul.f32 1.442695, %v802_v62  ;;  %v805_v1 = vsub.f32 %v693_v31, %v793_v63 }
 0x494   :  { %4579 = vpow2.f32 %v812_v0  ;;  %v818_v2 = vmul.f32 1.442695, %v805_v1 }
 0x495   :  { %v790_v3 = vpop.xlane.xlu0 %789 }
 0x496   :  { %4581 = vpow2.f32 %v818_v2  ;;  %v804_v4 = vsub.f32 %v688_v36, %v790_v3 }
 0x498   :  { %v816_v5 = vmul.f32 1.442695, %v804_v4 }
 0x499   :  { %v799_v6 = vpop.xlane.xlu1 %798  ;;  %v865_v28 = vpop.permute.xlu0 %864 }
 0x49a   :  { %4583 = vpow2.f32 %v816_v5  ;;  %v807_v7 = vsub.f32 %v772_v41, %v799_v6 }
 0x49c   :  { %v822_v8 = vmul.f32 1.442695, %v807_v7 }
 0x49d   :  { %v796_v9 = vpop.xlane.xlu1 %795  ;;  %v873_v30 = vpop.permute.xlu0 %872 }
 0x49e   :  { %4585 = vpow2.f32 %v822_v8  ;;  %v806_v10 = vsub.f32 %v767_v43, %v796_v9 }
 0x49f   :  { %v4578_v11 = vpop.eup %4577 }
 0x4a0   :  { %v820_v12 = vmul.f32 1.442695, %v806_v10  ;;  %v833_v14 = vsel %vm775_vm3, %v4578_v11, 0.0 }
 0x4a1   :  { %v4580_v15 = vpop.eup %4579  ;;  %834 = vadd.xlane.f32.xlu1 %v833_v14  ;;  %v869_v27 = vpop.permute.xlu1 %868 }
 0x4a2   :  { %4587 = vpow2.f32 %v820_v12  ;;  %v830_v20 = vsel %vm775_vm3, %v4580_v15, 0.0 }
 0x4a3   :  { %v5144_v16 = vpop.eup %4581 }
 0x4a4   :  { %v839_v19 = vsel %vm775_vm3, %v5144_v16, 0.0 }
 0x4a5   :  { %840 = vadd.xlane.f32.xlu0 %v839_v19  ;;  %831 = vadd.xlane.f32.xlu1 %v830_v20  ;;  %v867_v29 = vpop.permute.xlu1 %866  ;;  %v4877_v20 = vmov 1934713408  }
 0x4a7   :  { %v5149_v21 = vpop.eup %4583 }
 0x4a8   :  { %v836_v22 = vsel %vm775_vm3, %v5149_v21, 0.0 }
 0x4a9   :  { %837 = vadd.xlane.f32.xlu0 %v836_v22  ;;  %v871_v31 = vpop.permute.xlu1 %870 }
 0x4ab   :  { %v5153_v23 = vpop.eup %4585 }
 0x4ac   :  { %v845_v24 = vsel %vm775_vm3, %v5153_v23, 0.0 }
 0x4ad   :  { %846 = vadd.xlane.f32.xlu0 %v845_v24  ;;  %v877_v35 = vpop.permute.xlu1 %876 }
 0x4af   :  { %v5157_v25 = vpop.eup %4587 }
 0x4b0   :  { %v842_v26 = vsel %vm775_vm3, %v5157_v25, 0.0 }
 0x4b1   :  { %843 = vadd.xlane.f32.xlu1 %v842_v26  ;;  %v875_v37 = vpop.permute.xlu1 %874 }
 0x4b5   :  { %v879_v41 = vpop.permute.xlu1 %878 }
 0x4da   :  { %888 = vxpose.xlu0.b32.start [1/2] (short) (narrow) %v865_v28, 8 }
 0x4dd   :  { %v829_v34 = vpop.xlane.xlu0 %828 }
 0x4de   :  { %4589 = vrcp.f32 %v829_v34  ;;  %889 = vxpose.xlu0.b32.end [2/2] (short) (narrow) %v867_v29, 8 }
 0x4e1   :  { %v826_v36 = vpop.xlane.xlu0 %825 }
 0x4e2   :  { %4591 = vrcp.f32 %v826_v36  ;;  %952 = vxpose.xlu0.b32.start [1/2] (short) (narrow) %v873_v30, 8 }
 0x4e4   :  { %920 = vxpose.xlu1.b32.start [1/2] (short) (narrow) %v869_v27, 8 }
 0x4e6   :  { %953 = vxpose.xlu0.b32.end [2/2] (short) (narrow) %v875_v37, 8 }
 0x4e8   :  { %921 = vxpose.xlu1.b32.end [2/2] (short) (narrow) %v871_v31, 8 }
 0x4ea   :  { %984 = vxpose.xlu0.b32.start [1/2] (short) (narrow) %v877_v35, 8 }
 0x4eb   :  { %v4590_v38 = vpop.eup %4589 }
 0x4ec   :  { %v857_v40 = vmul.f32 %v4590_v38, %v5135_v54 }
 0x4ee   :  { %4336 = vmatpush3.xpose.msk.msra.mxu0 %vm775_vm3, %v857_v40  ;;  %985 = vxpose.xlu0.b32.end [2/2] (short) (narrow) %v879_v41, 8 }
 0x4ef   :  { %v4592_v42 = vpop.eup %4591  ;;  %4337 = vmatprep.subr.mxu0 %v4870_v13 }
 0x4f0   :  { %v856_v43 = vmul.f32 %v4592_v42, %v5139_v56 }
 0x4f2   :  { %4338 = vmatpush3.xpose.msk.msra.mxu0 %vm775_vm3, %v856_v43 }
 0x4f3   :  { %4349 = vmatprep.subr.mxu0 %v4870_v13 }
 0x52a   :  { %v835_v44 = vpop.xlane.xlu1 %834 }
 0x52b   :  { %4593 = vrcp.f32 %v835_v44 }
 0x52e   :  { %v832_v45 = vpop.xlane.xlu1 %831  ;;  %v841_v52 = vpop.xlane.xlu0 %840 }
 0x52f   :  { %4595 = vrcp.f32 %v832_v45 }
 0x530   :  { %4597 = vrcp.f32 %v841_v52 }
 0x532   :  { %v838_v53 = vpop.xlane.xlu0 %837 }
 0x533   :  { %4599 = vrcp.f32 %v838_v53 }
 0x536   :  { %v847_v54 = vpop.xlane.xlu0 %846 }
 0x537   :  { %4601 = vrcp.f32 %v847_v54 }
 0x538   :  { %v4594_v48 = vpop.eup %4593 }
 0x539   :  { %v859_v49 = vmul.f32 %v4594_v48, %v4578_v11 }
 0x53a   :  { %v844_v55 = vpop.xlane.xlu1 %843 }
 0x53b   :  { %4343 = vmatpush3.xpose.msk.msra.mxu1 %vm775_vm3, %v859_v49  ;;  %4603 = vrcp.f32 %v844_v55 }
 0x53c   :  { %4344 = vmatprep.subr.mxu1 %v4870_v13  ;;  %v4596_v50 = vpop.eup %4595 }
 0x53d   :  { %v858_v51 = vmul.f32 %v4596_v50, %v4580_v15  ;;  %v4598_v56 = vpop.eup %4597  ;;  %v4876_v15 = vmov 1983009808  }
 0x53e   :  { %v861_v58 = vmul.f32 %v4598_v56, %v5144_v16  ;;  %v1463_v16 = vunpack.c.l.s4 %v4876_v15 }
 0x53f   :  { %4345 = vmatpush3.xpose.msk.msra.mxu1 %vm775_vm3, %v858_v51 }
 0x540   :  { %4356 = vmatprep.subr.mxu1 %v4870_v13  ;;  %v4600_v59 = vpop.eup %4599  ;;  %v1464_v22 = vunpack.c.0.s8 %v1463_v16 }
 0x541   :  { %v860_v60 = vmul.f32 %v4600_v59, %v5149_v21  ;;  %v1495_v21 = vunpack.c.l.s4 %v4877_v20 }
 0x542   :  { %v5196_v26 = vsub.s32 %v1464_v22, %v5016_v32 }
 0x544   :  { %v4602_v61 = vpop.eup %4601 }
 0x545   :  { %v863_v0 = vmul.f32 %v4602_v61, %v5153_v23 }
 0x548   :  { %v4604_v1 = vpop.eup %4603 }
 0x549   :  { %v862_v2 = vmul.f32 %v4604_v1, %v5157_v25  ;;  %v1496_v25 = vunpack.c.0.s8 %v1495_v21 }
 0x54b   :  { %v5199_v35 = vsub.s32 %v1496_v25, %v5016_v32 }
 0x556   :  { %v904_v57 = vpop.trf.xlu0 }
 0x557   :  { %4340 = vmatmul.mubr.msk.f32.vlgmr.msra.gmra.mxu0 %vm775_vm3, %v904_v57 }
 0x558   :  { %4350 = vmatpush3.xpose.msk.msra.mxu0 %vm775_vm3, %v861_v58  ;;  %4353 = vmatprep.mubr.msk.f32.mxu0 %vm4871_vm1, %v4870_v13 }
 0x559   :  { %4351 = vmatprep.subr.mxu0 %v4870_v13 }
 0x55c   :  { %4352 = vmatpush3.xpose.msk.msra.mxu0 %vm775_vm3, %v860_v60 }
 0x55d   :  { %4363 = vmatprep.subr.bf16.mxu0 %v4870_v13 }
 0x55e   :  { %v968_v62 = vpop.trf.xlu0 }
 0x55f   :  { %4354 = vmatmul.mubr.msk.f32.vlgmr.msra.gmra.mxu0 %vm775_vm3, %v968_v62 }
 0x560   :  { %v936_v63 = vpop.trf.xlu1  ;;  %4367 = vmatprep.mubr.msk.bf16.mxu0 %vm4871_vm1, %v4870_v13 }
 0x561   :  { %4347 = vmatmul.mubr.msk.f32.vlgmr.msra.gmra.mxu1 %vm775_vm3, %v936_v63 }
 0x562   :  { %4357 = vmatpush3.xpose.msk.msra.mxu1 %vm775_vm3, %v863_v0  ;;  %4360 = vmatprep.mubr.msk.f32.mxu1 %vm4871_vm1, %v4870_v13 }
 0x563   :  { %4358 = vmatprep.subr.mxu1 %v4870_v13 }
 0x566   :  { %4359 = vmatpush3.xpose.msk.msra.mxu1 %vm775_vm3, %v862_v2  ;;  %v1000_v3 = vpop.trf.xlu0 }
 0x567   :  { %4371 = vmatprep.subr.bf16.mxu1 %v4870_v13 }
 0x569   :  { %4361 = vmatmul.mubr.msk.f32.vlgmr.msra.gmra.mxu1 %vm775_vm3, %v1000_v3 }
 0x56a   :  { %4375 = vmatprep.mubr.msk.bf16.mxu1 %vm4871_vm1, %v4870_v13 }
 0x617   :  { %v1091_v4 = vpop.f32.mrf.mxu0 }
 0x618   :  { %1332 = vxpose.xlu1.b32.start.end [1/1] (short) (narrow) %v1091_v4, 16 }
 0x619   :  { %v4341_v5 = vpop.f32.mrf.mxu0 }
 0x61f   :  { %v1249_v6 = vpop.f32.mrf.mxu0 }
 0x620   :  { %1396 = vxpose.xlu1.b32.start.end [1/1] (short) (narrow) %v1249_v6, 16 }
 0x621   :  { %v1170_v7 = vpop.f32.mrf.mxu1  ;;  %v4355_v8 = vpop.f32.mrf.mxu0 }
 0x622   :  { %1364 = vxpose.xlu0.b32.start.end [1/1] (short) (narrow) %v1170_v7, 16 }
 0x623   :  { %v4348_v9 = vpop.f32.mrf.mxu1 }
 0x629   :  { %v1328_v10 = vpop.f32.mrf.mxu1 }
 0x62a   :  { %1428 = vxpose.xlu0.b32.start.end [1/1] (short) (narrow) %v1328_v10, 16 }
 0x62b   :  { %v4362_v11 = vpop.f32.mrf.mxu1 }
 0x694   :  { %v1348_v12 = vpop.trf.xlu1 }
 0x698   :  { %v1349_v14 = vpop.trf.xlu1 }
 0x69c   :  { %v1412_v23 = vpop.trf.xlu1 }
 0x69d   :  { %v1460_v27 = vcombine.low %v1348_v12, %v1412_v23  ;;  %v1461_v28 = vcombine.high %v1348_v12, %v1412_v23 }
 0x69e   :  { %v1380_v19 = vpop.trf.xlu0 }
 0x69f   :  { %v1468_v36 = vrot.slane %v1460_v27, %v5196_v26  ;;  %v1475_v37 = vrot.slane %v1461_v28, %v5196_v26 }
 0x6a0   :  { %v1413_v30 = vpop.trf.xlu1 }
 0x6a1   :  { %v1528_v41 = vcombine.low %v1349_v14, %v1413_v30  ;;  %v1529_v42 = vcombine.high %v1349_v14, %v1413_v30 }
 0x6a2   :  { %v1381_v24 = vpop.trf.xlu0 }
 0x6a3   :  { %v1536_v56 = vrot.slane %v1528_v41, %v5196_v26  ;;  %v1543_v57 = vrot.slane %v1529_v42, %v5196_v26 }
 0x6a6   :  { %v1444_v29 = vpop.trf.xlu0 }
 0x6a7   :  { %v1476_v31 = vcombine.low %v1380_v19, %v1444_v29  ;;  %v1477_v34 = vcombine.high %v1380_v19, %v1444_v29  ;;  %v4547_v19 = vld [vmem:[%s5615_s6 + $0x8] sm:$0xff]  }
 0x6a8   :  { %4364 = vmatpush3.bf16.msra.mxu0 %v4547_v19 }
 0x6a9   :  { %v1484_v38 = vrot.slane %v1476_v31, %v5196_v26  ;;  %v1491_v40 = vrot.slane %v1477_v34, %v5196_v26  ;;  %4365 = vmatprep.subr.bf16.mxu0 %v4870_v13 }
 0x6aa   :  { %v1445_v43 = vpop.trf.xlu0 }
 0x6ab   :  { %v1492_v44 = vcombine.low %v1468_v36, %v1484_v38  ;;  %v1493_v45 = vcombine.high %v1468_v36, %v1484_v38  ;;  %v1508_v48 = vcombine.low %v1475_v37, %v1491_v40  ;;  %v1509_v49 = vcombine.high %v1475_v37, %v1491_v40  ;;  %v4548_v37 = vld [vmem:[%s5615_s6] sm:$0xff]  }
 0x6ac   :  { %v1544_v50 = vcombine.low %v1381_v24, %v1445_v43  ;;  %v1545_v51 = vcombine.high %v1381_v24, %v1445_v43  ;;  %4366 = vmatpush3.bf16.msra.mxu0 %v4548_v37 }
 0x6ad   :  { %v1500_v52 = vrot.slane %v1492_v44, %v5199_v35  ;;  %v1507_v53 = vrot.slane %v1493_v45, %v5199_v35  ;;  %v1516_v54 = vrot.slane %v1508_v48, %v5199_v35  ;;  %v1523_v55 = vrot.slane %v1509_v49, %v5199_v35  ;;  %4379 = vmatprep.subr.bf16.mxu0 %v4870_v13 }
 0x6ae   :  { %v1552_v58 = vrot.slane %v1544_v50, %v5196_v26  ;;  %v1559_v59 = vrot.slane %v1545_v51, %v5196_v26 }
 0x6af   :  { %v1596_v60 = vcombine.low %v1500_v52, %v1507_v53  ;;  %v4141_v61 = vcombine.high %v1500_v52, %v1507_v53  ;;  %v1612_v62 = vcombine.low %v1516_v54, %v1523_v55  ;;  %v4142_v63 = vcombine.high %v1516_v54, %v1523_v55 }
 0x6b0   :  { %v1560_v0 = vcombine.low %v1536_v56, %v1552_v58  ;;  %v1561_v1 = vcombine.high %v1536_v56, %v1552_v58  ;;  %v1576_v2 = vcombine.low %v1543_v57, %v1559_v59  ;;  %v1577_v3 = vcombine.high %v1543_v57, %v1559_v59 }
 0x6b1   :  { %v1603_v4 = vrot.slane %v1596_v60, %v5196_v26  ;;  %v1611_v5 = vrot.slane %v4141_v61, %v5196_v26  ;;  %v1619_v6 = vrot.slane %v1612_v62, %v5196_v26  ;;  %v1627_v7 = vrot.slane %v4142_v63, %v5196_v26 }
 0x6b2   :  { %v1568_v8 = vrot.slane %v1560_v0, %v5199_v35  ;;  %v1575_v9 = vrot.slane %v1561_v1, %v5199_v35  ;;  %v1584_v10 = vrot.slane %v1576_v2, %v5199_v35  ;;  %v1591_v11 = vrot.slane %v1577_v3, %v5199_v35 }
 0x6b3   :  { %v1629_v12 = vcombine.high %v1603_v4, %v1611_v5  ;;  %v1645_v14 = vcombine.high %v1619_v6, %v1627_v7  ;;  %v1628_v15 = vcombine.low %v1603_v4, %v1611_v5  ;;  %v1644_v16 = vcombine.low %v1619_v6, %v1627_v7 }
 0x6b4   :  { %v1664_v20 = vcombine.low %v1568_v8, %v1575_v9  ;;  %v4143_v21 = vcombine.high %v1568_v8, %v1575_v9  ;;  %v1680_v22 = vcombine.low %v1584_v10, %v1591_v11  ;;  %v4144_v23 = vcombine.high %v1584_v10, %v1591_v11  ;;  %v5256_v11 = vld [vmem:[%s5619_s10] sm:$0x3f] }
 0x6b5   :  { %v1636_v24 = vrot.slane %v1628_v15, %v5199_v35  ;;  %v1652_v25 = vrot.slane %v1644_v16, %v5199_v35  ;;  %v1643_v31 = vrot.slane %v1629_v12, %v5199_v35  ;;  %v1659_v34 = vrot.slane %v1645_v14, %v5199_v35 }
 0x6b6   :  { %v1671_v27 = vrot.slane %v1664_v20, %v5196_v26  ;;  %v1679_v28 = vrot.slane %v4143_v21, %v5196_v26  ;;  %v1687_v29 = vrot.slane %v1680_v22, %v5196_v26  ;;  %v1695_v30 = vrot.slane %v4144_v23, %v5196_v26 }
 0x6b7   :  { %v1660_v36 = vcombine.low %v1636_v24, %v1652_v25  ;;  %v1662_v49 = vcombine.low %v1643_v31, %v1659_v34  ;;  %v1661_v51 = vcombine.high %v1636_v24, %v1652_v25  ;;  %v1663_v57 = vcombine.high %v1643_v31, %v1659_v34  ;;  %v4550_v31 = vld [vmem:[%s5616_s7] sm:$0xff]  }
 0x6b8   :  { %v1697_v38 = vcombine.high %v1671_v27, %v1679_v28  ;;  %v1713_v40 = vcombine.high %v1687_v29, %v1695_v30  ;;  %v1696_v41 = vcombine.low %v1671_v27, %v1679_v28  ;;  %v1712_v42 = vcombine.low %v1687_v29, %v1695_v30 }
 0x6b9   :  { %v1771_v12 = vrot.slane %v5256_v11, %v5019_v33 }
 0x6ba   :  { %v1711_v43 = vrot.slane %v1697_v38, %v5199_v35  ;;  %v1727_v44 = vrot.slane %v1713_v40, %v5199_v35  ;;  %v1704_v45 = vrot.slane %v1696_v41, %v5199_v35  ;;  %v1720_v48 = vrot.slane %v1712_v42, %v5199_v35 }
 0x6bc   :  { %v1730_v50 = vcombine.low %v1711_v43, %v1727_v44  ;;  %v1729_v52 = vcombine.high %v1704_v45, %v1720_v48  ;;  %v1728_v53 = vcombine.low %v1704_v45, %v1720_v48  ;;  %v1731_v56 = vcombine.high %v1711_v43, %v1727_v44 }
 0x6be   :  { %v4520_v54 = vpack.i.bf16 %v1730_v50, %v1662_v49  ;;  %v4515_v55 = vpack.i.bf16 %v1729_v52, %v1661_v51  ;;  %v4525_v58 = vpack.i.bf16 %v1731_v56, %v1663_v57  ;;  %v1865_v56 = vrot.slane %v5256_v11, %v5023_v39 }
 0x6bf   :  { %v5277_v57 = vsub.s32 2, %v5016_v32 }
 0x6c0   :  { %4521 = vrot.lane.b32.xlu0 %v4520_v54, %s4862_s20  ;;  %4516 = vrot.lane.b32.xlu1 %v4515_v55, %s4859_s28 }
 0x6c4   :  { %4526 = vrot.lane.b32.xlu1 %v4525_v58, %s4878_s27 }
 0x732   :  { %v4522_v59 = vpop.permute.xlu0 %4521  ;;  %v4517_v60 = vpop.permute.xlu1 %4516 }
 0x733   :  { %v4519_v61 = vunpack.i.h.bf16 %v4517_v60  ;;  %v4518_v62 = vunpack.i.l.bf16 %v4517_v60  ;;  %v4524_v63 = vunpack.i.h.bf16 %v4522_v59  ;;  %v4523_v0 = vunpack.i.l.bf16 %v4522_v59 }
 0x735   :  { %v1756_v1 = vsel %vm458_vm2, %v1660_v36, %v4518_v62  ;;  %v1757_v2 = vsel %vm458_vm2, %v1728_v53, %v4519_v61  ;;  %v1871_v62 = vrot.slane %v5256_v11, %v5277_v57 }
 0x736   :  { %v4527_v3 = vpop.permute.xlu1 %4526  ;;  %v1758_v6 = vsel %vm775_vm3, %v1756_v1, %v4523_v0  ;;  %v1759_v7 = vsel %vm775_vm3, %v1757_v2, %v4524_v63 }
 0x737   :  { %v4529_v4 = vunpack.i.h.bf16 %v4527_v3  ;;  %v4528_v5 = vunpack.i.l.bf16 %v4527_v3  ;;  %v4551_v3 = vld [vmem:[%s5618_s9 + $0x18] sm:$0xff]  }
 0x739   :  { %v1761_v8 = vsel %vm1760_vm4, %v1758_v6, %v4528_v5  ;;  %v1762_v9 = vsel %vm1760_vm4, %v1759_v7, %v4529_v4  ;;  %v4552_v4 = vld [vmem:[%s5618_s9 + $0x10] sm:$0xff]   ;;  %v4553_v5 = vld [vmem:[%s5618_s9 + $0x8] sm:$0xff]   ;;  %v4554_v6 = vld [vmem:[%s5618_s9] sm:$0xff]  }
 0x73a   :  { %v1763_v10 = vpack.c.bf16 %v1762_v9, %v1761_v8  ;;  %v4148_v7 = vld [vmem:[#allocation11] ss:$0 sm:$0xff] }
 0x73c   :  { %4368 = vmatmul.mubr.msk.bf16.vlgmr.msra.gmra.mxu0 %vm164_vm0, %v1763_v10 }
 0x73d   :  { %4387 = vmatprep.mubr.msk.bf16.mxu0 %vm4871_vm1, %v4870_v13  ;;  %4380 = vmatpush3.bf16.msra.mxu0 %v4551_v3 }
 0x73e   :  { %4381 = vmatprep.subr.bf16.mxu0 %v4870_v13 }
 0x741   :  { %4382 = vmatpush3.bf16.msra.mxu0 %v4552_v4 }
 0x742   :  { %4383 = vmatprep.subr.bf16.mxu0 %v4870_v13 }
 0x745   :  { %4384 = vmatpush3.bf16.msra.mxu0 %v4553_v5 }
 0x746   :  { %4385 = vmatprep.subr.bf16.mxu0 %v4870_v13 }
 0x749   :  { %4386 = vmatpush3.bf16.msra.mxu0 %v4554_v6 }
 0x7fc   :  { %v1821_v14 = vpop.f32.mrf.mxu0 }
 0x7fd   :  { %v1822_v15 = vadd.f32 %v1821_v14, %v1771_v12 }
 0x7fe   :  { %v4369_v16 = vpop.f32.mrf.mxu0 }
 0x7ff   :  { %v1828_v19 = vadd.f32 %v1822_v15, %v5026_v46  ;;  %v4549_v46 = vld [vmem:[%s5616_s7 + $0x8] sm:$0xff]  }
 0x800   :  { %v1824_v20 = vpop.f32.mrf.mxu0  ;;  %4372 = vmatpush3.bf16.msra.mxu1 %v4549_v46 }
 0x801   :  { %v1825_v21 = vadd.f32 %v1824_v20, %v1771_v12  ;;  %v1830_v22 = vsel %vm164_vm0, %v1828_v19, 0.0  ;;  %v1838_v23 = vmul.f32 %v1828_v19, %v1828_v19  ;;  %4373 = vmatprep.subr.bf16.mxu1 %v4870_v13 }
 0x802   :  { %1831 = vadd.xlane.f32.xlu1 %v1830_v22  ;;  %v4370_v24 = vpop.f32.mrf.mxu0 }
 0x803   :  { %v1829_v25 = vadd.f32 %v1825_v21, %v5028_v47  ;;  %v1840_v27 = vsel %vm164_vm0, %v1838_v23, 0.0 }
 0x804   :  { %4374 = vmatpush3.bf16.msra.mxu1 %v4550_v31 }
 0x805   :  { %v1833_v28 = vsel %vm164_vm0, %v1829_v25, 0.0  ;;  %v1839_v29 = vmul.f32 %v1829_v25, %v1829_v25  ;;  %4391 = vmatprep.subr.bf16.mxu1 %v4870_v13 }
 0x806   :  { %1841 = vadd.xlane.f32.xlu1 %v1840_v27  ;;  %1834 = vadd.xlane.f32.xlu0 %v1833_v28 }
 0x807   :  { %v1843_v30 = vsel %vm164_vm0, %v1839_v29, 0.0 }
 0x80a   :  { %1844 = vadd.xlane.f32.xlu0 %v1843_v30 }
 0x88b   :  { %v1832_v47 = vpop.xlane.xlu1 %1831 }
 0x88c   :  { %v1836_v34 = vmul.f32 0.03125, %v1832_v47 }
 0x88e   :  { %v1848_v38 = vmul.f32 %v1836_v34, %v1836_v34  ;;  %v1854_v53 = vsub.f32 %v1828_v19, %v1836_v34 }
 0x88f   :  { %v1842_v36 = vpop.xlane.xlu1 %1841  ;;  %v1835_v37 = vpop.xlane.xlu0 %1834 }
 0x890   :  { %v1846_v40 = vmul.f32 0.03125, %v1842_v36  ;;  %v1837_v41 = vmul.f32 0.03125, %v1835_v37 }
 0x892   :  { %v1850_v42 = vsub.f32 %v1846_v40, %v1848_v38  ;;  %v1849_v45 = vmul.f32 %v1837_v41, %v1837_v41  ;;  %v1855_v58 = vsub.f32 %v1829_v25, %v1837_v41  ;;  %v1971_v40 = vsub.s32 3, %v5016_v32 }
 0x893   :  { %v1845_v43 = vpop.xlane.xlu0 %1844 }
 0x894   :  { %v1852_v44 = vmax.f32 %v1850_v42, 0.0  ;;  %v1847_v48 = vmul.f32 0.03125, %v1845_v43  ;;  %v1972_v41 = vrot.slane %v5256_v11, %v1971_v40 }
 0x896   :  { %v1856_v49 = vadd.f32 1e-12, %v1852_v44  ;;  %v1851_v50 = vsub.f32 %v1847_v48, %v1849_v45 }
 0x898   :  { %4605 = vrsqrt.f32 %v1856_v49  ;;  %v1853_v51 = vmax.f32 %v1851_v50, 0.0 }
 0x89a   :  { %v1857_v52 = vadd.f32 1e-12, %v1853_v51 }
 0x89c   :  { %4607 = vrsqrt.f32 %v1857_v52 }
 0x8a5   :  { %v4606_v54 = vpop.eup %4605 }
 0x8a6   :  { %v1860_v55 = vmul.f32 %v4606_v54, %v1854_v53 }
 0x8a8   :  { %v1866_v61 = vmul.f32 %v1865_v56, %v1860_v55 }
 0x8a9   :  { %v4608_v59 = vpop.eup %4607 }
 0x8aa   :  { %v1861_v60 = vmul.f32 %v4608_v59, %v1855_v58  ;;  %v1872_v0 = vadd.f32 %v1871_v62, %v1866_v61  ;;  %v4555_v59 = vld [vmem:[%s5613_s4 + $0x18] sm:$0xff]  }
 0x8ac   :  { %v1867_v63 = vmul.f32 %v1865_v56, %v1861_v60  ;;  %v4556_v60 = vld [vmem:[%s5613_s4 + $0x10] sm:$0xff]  }
 0x8ae   :  { %v1873_v1 = vadd.f32 %v1871_v62, %v1867_v63 }
 0x8b0   :  { %v1874_v2 = vpack.c.bf16 %v1873_v1, %v1872_v0 }
 0x8b2   :  { %4376 = vmatmul.mubr.msk.bf16.vlgmr.msra.gmra.mxu1 %vm164_vm0, %v1874_v2 }
 0x8b3   :  { %4395 = vmatprep.mubr.msk.bf16.mxu1 %vm4871_vm1, %v4870_v13  ;;  %4392 = vmatpush3.bf16.msra.mxu1 %v4555_v59 }
 0x8b4   :  { %4393 = vmatprep.subr.bf16.mxu1 %v4870_v13 }
 0x8b7   :  { %4394 = vmatpush3.bf16.msra.mxu1 %v4556_v60 }
 0x972   :  { %v1935_v8 = vpop.f32.mrf.mxu1 }
 0x973   :  { %v1936_v9 = vadd.f32 %v4148_v7, %v1935_v8 }
 0x974   :  { %v4377_v10 = vpop.f32.mrf.mxu1 }
 0x975   :  { %v1942_v12 = vmul.f32 %v1936_v9, %v1936_v9 }
 0x976   :  { %v1938_v14 = vpop.f32.mrf.mxu1 }
 0x977   :  { %v1944_v15 = vmul.f32 %v1942_v12, %v1936_v9  ;;  %v1939_v16 = vadd.f32 %v4148_v7, %v1938_v14 }
 0x978   :  { %v4378_v19 = vpop.f32.mrf.mxu1 }
 0x979   :  { %v1946_v20 = vmul.f32 0.044715, %v1944_v15  ;;  %v1943_v21 = vmul.f32 %v1939_v16, %v1939_v16  ;;  %v2078_v15 = vsub.s32 4, %v5016_v32 }
 0x97b   :  { %v1948_v22 = vadd.f32 %v1946_v20, %v1936_v9  ;;  %v1945_v23 = vmul.f32 %v1943_v21, %v1939_v16  ;;  %v2079_v21 = vrot.slane %v5256_v11, %v2078_v15 }
 0x97d   :  { %v1950_v24 = vmul.f32 0.7978846, %v1948_v22  ;;  %v1947_v25 = vmul.f32 0.044715, %v1945_v23  ;;  %v2084_v22 = vsub.s32 5, %v5016_v32  ;;  %v4567_v32 = vld [vmem:[#allocation13 + $0x8] sm:$0xff]  }
 0x97f   :  { %4609 = vtanh.f32 %v1950_v24  ;;  %v1949_v27 = vadd.f32 %v1947_v25, %v1939_v16 }
 0x981   :  { %v1951_v28 = vmul.f32 0.7978846, %v1949_v27 }
 0x983   :  { %4611 = vtanh.f32 %v1951_v28  ;;  %v2085_v28 = vrot.slane %v5256_v11, %v2084_v22 }
 0x98c   :  { %v4610_v29 = vpop.eup %4609 }
 0x98d   :  { %v1954_v30 = vadd.f32 1.0, %v4610_v29 }
 0x98f   :  { %v1956_v31 = vmul.f32 0.5, %v1954_v30 }
 0x990   :  { %v4612_v46 = vpop.eup %4611 }
 0x991   :  { %v1955_v47 = vadd.f32 1.0, %v4612_v46  ;;  %v1958_v36 = vmul.f32 %v1956_v31, %v1936_v9 }
 0x993   :  { %v1957_v34 = vmul.f32 0.5, %v1955_v47  ;;  %v4162_v47 = vld [vmem:[#allocation10 + $0x1] ss:$0 sm:$0xff] }
 0x995   :  { %v1959_v37 = vmul.f32 %v1957_v34, %v1939_v16 }
 0x997   :  { %v1960_v38 = vpack.c.bf16 %v1959_v37, %v1958_v36 }
 0x999   :  { %4388 = vmatmul.mubr.msk.bf16.vlgmr.msra.gmra.mxu0 %vm1997_vm5, %v1960_v38 }
 0xa59   :  { %v2035_v42 = vpop.f32.mrf.mxu0 }
 0xa5a   :  { %v2036_v43 = vadd.f32 %v2035_v42, %v1972_v41 }
 0xa5b   :  { %v4389_v44 = vpop.f32.mrf.mxu0 }
 0xa5c   :  { %v2042_v45 = vadd.f32 %v2036_v43, %v1872_v0 }
 0xa5d   :  { %v2038_v48 = vpop.f32.mrf.mxu0 }
 0xa5e   :  { %v2039_v49 = vadd.f32 %v2038_v48, %v1972_v41  ;;  %v2044_v50 = vsel %vm164_vm0, %v2042_v45, 0.0  ;;  %v2052_v51 = vmul.f32 %v2042_v45, %v2042_v45 }
 0xa5f   :  { %2045 = vadd.xlane.f32.xlu1 %v2044_v50  ;;  %v4390_v52 = vpop.f32.mrf.mxu0 }
 0xa60   :  { %v2043_v53 = vadd.f32 %v2039_v49, %v1873_v1  ;;  %v2054_v54 = vsel %vm164_vm0, %v2052_v51, 0.0 }
 0xa62   :  { %v2047_v55 = vsel %vm164_vm0, %v2043_v53, 0.0  ;;  %v2053_v56 = vmul.f32 %v2043_v53, %v2043_v53 }
 0xa63   :  { %2055 = vadd.xlane.f32.xlu1 %v2054_v54  ;;  %2048 = vadd.xlane.f32.xlu0 %v2047_v55 }
 0xa64   :  { %v2057_v58 = vsel %vm164_vm0, %v2053_v56, 0.0 }
 0xa67   :  { %2058 = vadd.xlane.f32.xlu0 %v2057_v58 }
 0xae8   :  { %v2046_v61 = vpop.xlane.xlu1 %2045 }
 0xae9   :  { %v2050_v62 = vmul.f32 0.03125, %v2046_v61 }
 0xaeb   :  { %v2062_v1 = vmul.f32 %v2050_v62, %v2050_v62  ;;  %v2068_v16 = vsub.f32 %v2042_v45, %v2050_v62 }
 0xaec   :  { %v2056_v63 = vpop.xlane.xlu1 %2055  ;;  %v2049_v0 = vpop.xlane.xlu0 %2048 }
 0xaed   :  { %v2060_v2 = vmul.f32 0.03125, %v2056_v63  ;;  %v2051_v3 = vmul.f32 0.03125, %v2049_v0 }
 0xaef   :  { %v2064_v4 = vsub.f32 %v2060_v2, %v2062_v1  ;;  %v2063_v7 = vmul.f32 %v2051_v3, %v2051_v3  ;;  %v2069_v23 = vsub.f32 %v2043_v53, %v2051_v3 }
 0xaf0   :  { %v2059_v5 = vpop.xlane.xlu0 %2058 }
 0xaf1   :  { %v2066_v6 = vmax.f32 %v2064_v4, 0.0  ;;  %v2061_v8 = vmul.f32 0.03125, %v2059_v5 }
 0xaf3   :  { %v2070_v9 = vadd.f32 1e-12, %v2066_v6  ;;  %v2065_v10 = vsub.f32 %v2061_v8, %v2063_v7 }
 0xaf5   :  { %4613 = vrsqrt.f32 %v2070_v9  ;;  %v2067_v12 = vmax.f32 %v2065_v10, 0.0 }
 0xaf7   :  { %v2071_v14 = vadd.f32 1e-12, %v2067_v12 }
 0xaf9   :  { %4615 = vrsqrt.f32 %v2071_v14 }
 0xb02   :  { %v4614_v19 = vpop.eup %4613 }
 0xb03   :  { %v2074_v20 = vmul.f32 %v4614_v19, %v2068_v16 }
 0xb05   :  { %v2080_v27 = vmul.f32 %v2079_v21, %v2074_v20 }
 0xb06   :  { %v4616_v24 = vpop.eup %4615 }
 0xb07   :  { %v2075_v25 = vmul.f32 %v4616_v24, %v2069_v23  ;;  %v5323_v30 = vadd.f32 %v2085_v28, %v2080_v27 }
 0xb09   :  { %v2081_v29 = vmul.f32 %v2079_v21, %v2075_v25 }
 0xb0b   :  { %v5325_v46 = vadd.f32 %v2085_v28, %v2081_v29 }
 0xb0d   :  { %v2090_v31 = vpack.c.bf16 %v5325_v46, %v5323_v30 }
 0xb0f   :  { %4396 = vmatmul.mubr.msk.bf16.vlgmr.msra.gmra.mxu1 %vm164_vm0, %v2090_v31 }
 0xbcf   :  { %v2153_v34 = vpop.f32.mrf.mxu1 }
 0xbd0   :  { %v5330_v36 = vadd.f32 %v4162_v47, %v2153_v34 }
 0xbd1   :  { %v4397_v37 = vpop.f32.mrf.mxu1 }
 0xbd2   :  { %2162 = vrot.lane.b32.xlu1 %v5330_v36, %s4873_s17  ;;  %4401 = vmatprep.mubr.msk.f32.mxu1 %vm458_vm2, %v5330_v36 }
 0xbd3   :  { %v2156_v11 = vpop.f32.mrf.mxu1 }
 0xbd4   :  { %v5336_v38 = vadd.f32 %v4162_v47, %v2156_v11 }
 0xbd5   :  { %v4398_v41 = vpop.f32.mrf.mxu1 }
 0xbd6   :  { %2166 = vrot.lane.b32.xlu1 %v5330_v36, %s4872_s16  ;;  %2164 = vrot.lane.b32.xlu0 %v5336_v38, %s4873_s17 }
 0xbda   :  { %2170 = vrot.lane.b32.xlu1 %v5330_v36, %s4874_s0  ;;  %2172 = vrot.lane.b32.xlu0 %v5336_v38, %s4874_s0 }
 0xbde   :  { %2168 = vrot.lane.b32.xlu1 %v5336_v38, %s4872_s16 }
 0xbe2   :  { %2174 = vrot.lane.b32.xlu1 %v5330_v36, %s4875_s18 }
 0xbe6   :  { %2176 = vrot.lane.b32.xlu1 %v5336_v38, %s4875_s18 }
 0xc44   :  { %v5352_v42 = vpop.permute.xlu1 %2162 }
 0xc45   :  { %4406 = vmatprep.mubr.msk.f32.mxu0 %vm458_vm2, %v5352_v42  ;;  %2178 = vrot.lane.b32.xlu0 %v5352_v42, %s4875_s18 }
 0xc48   :  { %v5358_v43 = vpop.permute.xlu1 %2166  ;;  %v5360_v44 = vpop.permute.xlu0 %2164 }
 0xc49   :  { %2182 = vrot.lane.b32.xlu1 %v5358_v43, %s4875_s18  ;;  %2180 = vrot.lane.b32.xlu0 %v5360_v44, %s4875_s18 }
 0xc4c   :  { %v5366_v45 = vpop.permute.xlu1 %2170  ;;  %v5370_v48 = vpop.permute.xlu0 %2172 }
 0xc4d   :  { %2186 = vrot.lane.b32.xlu0 %v5366_v45, %s4875_s18 }
 0xc50   :  { %v5372_v49 = vpop.permute.xlu1 %2168 }
 0xc51   :  { %2184 = vrot.lane.b32.xlu1 %v5372_v49, %s4875_s18  ;;  %2188 = vrot.lane.b32.xlu0 %v5370_v48, %s4875_s18 }
 0xc54   :  { %v2175_v50 = vpop.permute.xlu1 %2174 }
 0xc58   :  { %v2177_v51 = vpop.permute.xlu1 %2176 }
 0xc7a   :  { %2198 = vxpose.xlu1.b32.start [1/2] (short) (narrow) %v2175_v50, 8 }
 0xc7e   :  { %2199 = vxpose.xlu1.b32.end [2/2] (short) (narrow) %v2177_v51, 8 }
 0xcb7   :  { %v2179_v52 = vpop.permute.xlu0 %2178 }
 0xcb8   :  { %2230 = vxpose.xlu0.b32.start [1/2] (short) (narrow) %v2179_v52, 8 }
 0xcbb   :  { %v2181_v53 = vpop.permute.xlu0 %2180  ;;  %v2183_v54 = vpop.permute.xlu1 %2182 }
 0xcbc   :  { %2231 = vxpose.xlu0.b32.end [2/2] (short) (narrow) %v2181_v53, 8 }
 0xcbf   :  { %v2187_v56 = vpop.permute.xlu0 %2186 }
 0xcc0   :  { %2262 = vxpose.xlu0.b32.start [1/2] (short) (narrow) %v2183_v54, 8 }
 0xcc3   :  { %v2185_v55 = vpop.permute.xlu1 %2184  ;;  %v2189_v58 = vpop.permute.xlu0 %2188 }
 0xcc4   :  { %2263 = vxpose.xlu0.b32.end [2/2] (short) (narrow) %v2185_v55, 8 }
 0xcc8   :  { %2294 = vxpose.xlu0.b32.start [1/2] (short) (narrow) %v2187_v56, 8 }
 0xccc   :  { %2295 = vxpose.xlu0.b32.end [2/2] (short) (narrow) %v2189_v58, 8 }
 0xcf6   :  { %v2214_v59 = vpop.trf.xlu1 }
 0xcf7   :  { %4399 = vmatprep.subr.mxu1 %v2214_v59 }
 0xcf8   :  { %4400 = vmatpush3.msra.mxu1 %v2214_v59 }
 0xcf9   :  { %4402 = vmatmul.mubr.msk.f32.vlgmr.msra.gmra.mxu1 %vm458_vm2, %v5336_v38 }
 0xcfa   :  { %4411 = vmatprep.mubr.msk.f32.mxu1 %vm458_vm2, %v5358_v43 }
 0xd34   :  { %v2246_v60 = vpop.trf.xlu0 }
 0xd35   :  { %4404 = vmatprep.subr.mxu0 %v2246_v60 }
 0xd36   :  { %4405 = vmatpush3.msra.mxu0 %v2246_v60 }
 0xd37   :  { %4407 = vmatmul.mubr.msk.f32.vlgmr.msra.gmra.mxu0 %vm458_vm2, %v5360_v44 }
 0xd38   :  { %4416 = vmatprep.mubr.msk.f32.mxu0 %vm458_vm2, %v5366_v45 }
 0xd3c   :  { %v2278_v61 = vpop.trf.xlu0 }
 0xd3d   :  { %4409 = vmatprep.subr.mxu1 %v2278_v61 }
 0xd3e   :  { %4410 = vmatpush3.msra.mxu1 %v2278_v61 }
 0xd3f   :  { %4412 = vmatmul.mubr.msk.f32.vlgmr.msra.gmra.mxu1 %vm458_vm2, %v5372_v49  ;;  %4419 = vmatprep.subr.mxu1 %v4870_v13 }
 0xd40   :  { %4423 = vmatprep.mubr.msk.f32.mxu1 %vm4871_vm1, %v4870_v13 }
 0xd44   :  { %v2310_v62 = vpop.trf.xlu0 }
 0xd45   :  { %4414 = vmatprep.subr.mxu0 %v2310_v62 }
 0xd46   :  { %4415 = vmatpush3.msra.mxu0 %v2310_v62 }
 0xd47   :  { %4417 = vmatmul.mubr.msk.f32.vlgmr.msra.gmra.mxu0 %vm458_vm2, %v5370_v48  ;;  %4426 = vmatprep.subr.mxu0 %v4870_v13 }
 0xd48   :  { %4430 = vmatprep.mubr.msk.f32.mxu0 %vm4871_vm1, %v4870_v13 }
 0xdb9   :  { %v4403_v63 = vpop.f32.mrf.mxu1 }
 0xdba   :  { %v2402_v0 = vadd.f32 %v4403_v63, %v5099_v17 }
 0xdbb   :  { %v2396_v1 = vpop.f32.mrf.mxu1 }
 0xdbc   :  { %v2397_v2 = vadd.f32 %v2396_v1, %v5101_v18  ;;  %v2645_v3 = vsel %vm775_vm3, %v2402_v0, -inf }
 0xdbd   :  { %2646 = vmax.xlane.f32.xlu1 %v2645_v3 }
 0xdbe   :  { %v2642_v4 = vsel %vm775_vm3, %v2397_v2, -inf }
 0xdc1   :  { %2643 = vmax.xlane.f32.xlu1 %v2642_v4 }
 0xdf7   :  { %v4408_v5 = vpop.f32.mrf.mxu0 }
 0xdf8   :  { %v2481_v6 = vadd.f32 %v4408_v5, %v5099_v17 }
 0xdf9   :  { %v2475_v7 = vpop.f32.mrf.mxu0 }
 0xdfa   :  { %v5402_v8 = vadd.f32 %v2475_v7, %v5101_v18  ;;  %v2651_v9 = vsel %vm775_vm3, %v2481_v6, -inf }
 0xdfb   :  { %2652 = vmax.xlane.f32.xlu0 %v2651_v9 }
 0xdfc   :  { %v2648_v10 = vsel %vm775_vm3, %v5402_v8, -inf }
 0xdfd   :  { %2649 = vmax.xlane.f32.xlu1 %v2648_v10 }
 0xdff   :  { %v4413_v12 = vpop.f32.mrf.mxu1 }
 0xe00   :  { %v2560_v14 = vadd.f32 %v4413_v12, %v5099_v17 }
 0xe01   :  { %v2554_v16 = vpop.f32.mrf.mxu1 }
 0xe02   :  { %v2555_v19 = vadd.f32 %v2554_v16, %v5101_v18  ;;  %v2657_v20 = vsel %vm775_vm3, %v2560_v14, -inf }
 0xe03   :  { %2658 = vmax.xlane.f32.xlu1 %v2657_v20 }
 0xe04   :  { %v2654_v21 = vsel %vm775_vm3, %v2555_v19, -inf }
 0xe07   :  { %v4418_v23 = vpop.f32.mrf.mxu0  ;;  %2655 = vmax.xlane.f32.xlu1 %v2654_v21 }
 0xe08   :  { %v2639_v24 = vadd.f32 %v4418_v23, %v5099_v17 }
 0xe09   :  { %v2633_v25 = vpop.f32.mrf.mxu0 }
 0xe0a   :  { %v2634_v27 = vadd.f32 %v2633_v25, %v5101_v18  ;;  %v2663_v28 = vsel %vm775_vm3, %v2639_v24, -inf }
 0xe0b   :  { %2664 = vmax.xlane.f32.xlu0 %v2663_v28 }
 0xe0c   :  { %v2660_v29 = vsel %vm775_vm3, %v2634_v27, -inf }
 0xe0f   :  { %2661 = vmax.xlane.f32.xlu0 %v2660_v29 }
 0xe18   :  { %2730 = vrot.lane.b32.xlu1 %v5330_v36, %s4867_s2 }
 0xe1c   :  { %2732 = vrot.lane.b32.xlu1 %v5336_v38, %s4867_s2 }
 0xe20   :  { %2736 = vrot.lane.b32.xlu1 %v5360_v44, %s4867_s2 }
 0xe24   :  { %2738 = vrot.lane.b32.xlu1 %v5358_v43, %s4867_s2 }
 0xe28   :  { %2740 = vrot.lane.b32.xlu1 %v5372_v49, %s4867_s2 }
 0xe2c   :  { %2744 = vrot.lane.b32.xlu1 %v5370_v48, %s4867_s2 }
 0xe46   :  { %v2647_v17 = vpop.xlane.xlu1 %2646 }
 0xe47   :  { %v2667_v18 = vsub.f32 %v2402_v0, %v2647_v17 }
 0xe49   :  { %v2676_v31 = vmul.f32 1.442695, %v2667_v18 }
 0xe4a   :  { %v2644_v47 = vpop.xlane.xlu1 %2643 }
 0xe4b   :  { %4617 = vpow2.f32 %v2676_v31  ;;  %v2666_v34 = vsub.f32 %v2397_v2, %v2644_v47 }
 0xe4d   :  { %v2674_v36 = vmul.f32 1.442695, %v2666_v34 }
 0xe4f   :  { %4619 = vpow2.f32 %v2674_v36 }
 0xe58   :  { %v4618_v37 = vpop.eup %4617 }
 0xe59   :  { %v2693_v11 = vsel %vm775_vm3, %v4618_v37, 0.0 }
 0xe5a   :  { %2694 = vadd.xlane.f32.xlu1 %v2693_v11 }
 0xe5c   :  { %v5428_v38 = vpop.eup %4619 }
 0xe5d   :  { %v2690_v41 = vsel %vm775_vm3, %v5428_v38, 0.0 }
 0xe5e   :  { %2691 = vadd.xlane.f32.xlu1 %v2690_v41 }
 0xe84   :  { %v2653_v55 = vpop.xlane.xlu0 %2652 }
 0xe85   :  { %v2669_v56 = vsub.f32 %v2481_v6, %v2653_v55 }
 0xe86   :  { %v2650_v43 = vpop.xlane.xlu1 %2649 }
 0xe87   :  { %v2680_v59 = vmul.f32 1.442695, %v2669_v56  ;;  %v2668_v63 = vsub.f32 %v5402_v8, %v2650_v43 }
 0xe89   :  { %v2678_v1 = vmul.f32 1.442695, %v2668_v63 }
 0xe8c   :  { %v2659_v44 = vpop.xlane.xlu1 %2658 }
 0xe8d   :  { %v2671_v60 = vsub.f32 %v2560_v14, %v2659_v44 }
 0xe8f   :  { %v2684_v0 = vmul.f32 1.442695, %v2671_v60 }
 0xe90   :  { %v2656_v48 = vpop.xlane.xlu1 %2655 }
 0xe91   :  { %v2670_v49 = vsub.f32 %v2555_v19, %v2656_v48 }
 0xe93   :  { %v2682_v50 = vmul.f32 1.442695, %v2670_v49 }
 0xe94   :  { %v2731_v51 = vpop.permute.xlu1 %2730  ;;  %v2665_v61 = vpop.xlane.xlu0 %2664 }
 0xe95   :  { %4621 = vpow2.f32 %v2682_v50  ;;  %2754 = vxpose.xlu0.b32.start [1/2] (short) (narrow) %v2731_v51, 8  ;;  %v2673_v2 = vsub.f32 %v2639_v24, %v2665_v61 }
 0xe96   :  { %4623 = vpow2.f32 %v2680_v59 }
 0xe97   :  { %4625 = vpow2.f32 %v2684_v0  ;;  %v2688_v5 = vmul.f32 1.442695, %v2673_v2 }
 0xe98   :  { %v2733_v52 = vpop.permute.xlu1 %2732  ;;  %v2662_v3 = vpop.xlane.xlu0 %2661  ;;  %4627 = vpow2.f32 %v2678_v1 }
 0xe99   :  { %2755 = vxpose.xlu0.b32.end [2/2] (short) (narrow) %v2733_v52, 8  ;;  %4629 = vpow2.f32 %v2688_v5 }
 0xe9c   :  { %v2737_v58 = vpop.permute.xlu1 %2736 }
 0xea0   :  { %v2739_v62 = vpop.permute.xlu1 %2738 }
 0xea2   :  { %v5432_v53 = vpop.eup %4621 }
 0xea3   :  { %v2702_v54 = vsel %vm775_vm3, %v5432_v53, 0.0  ;;  %v4624_v6 = vpop.eup %4623 }
 0xea4   :  { %2703 = vadd.xlane.f32.xlu1 %v2702_v54  ;;  %v2741_v4 = vpop.permute.xlu1 %2740  ;;  %v2699_v10 = vsel %vm775_vm3, %v4624_v6, 0.0  ;;  %v4626_v12 = vpop.eup %4625 }
 0xea5   :  { %v2705_v14 = vsel %vm775_vm3, %v4626_v12, 0.0  ;;  %v4628_v16 = vpop.eup %4627 }
 0xea6   :  { %v2696_v19 = vsel %vm775_vm3, %v4628_v16, 0.0  ;;  %v4630_v20 = vpop.eup %4629 }
 0xea7   :  { %v2711_v23 = vsel %vm775_vm3, %v4630_v20, 0.0 }
 0xea8   :  { %v2745_v7 = vpop.permute.xlu1 %2744 }
 0xec2   :  { %2734 = vrot.lane.b32.xlu0 %v5352_v42, %s4867_s2  ;;  %v2672_v42 = vsub.f32 %v2634_v27, %v2662_v3 }
 0xec6   :  { %2742 = vrot.lane.b32.xlu0 %v5366_v45, %s4867_s2  ;;  %v2686_v45 = vmul.f32 1.442695, %v2672_v42 }
 0xec8   :  { %4631 = vpow2.f32 %v2686_v45 }
 0xed5   :  { %v5444_v21 = vpop.eup %4631 }
 0xed6   :  { %v2708_v27 = vsel %vm775_vm3, %v5444_v21, 0.0 }
 0xee3   :  { %v2695_v9 = vpop.xlane.xlu1 %2694 }
 0xee4   :  { %4633 = vrcp.f32 %v2695_v9 }
 0xee5   :  { %2700 = vadd.xlane.f32.xlu0 %v2699_v10 }
 0xee7   :  { %v2692_v8 = vpop.xlane.xlu1 %2691 }
 0xee8   :  { %4635 = vrcp.f32 %v2692_v8 }
 0xee9   :  { %2706 = vadd.xlane.f32.xlu0 %v2705_v14 }
 0xeed   :  { %2697 = vadd.xlane.f32.xlu0 %v2696_v19 }
 0xef1   :  { %v4634_v24 = vpop.eup %4633  ;;  %2712 = vadd.xlane.f32.xlu0 %v2711_v23 }
 0xef2   :  { %v2723_v25 = vmul.f32 %v4634_v24, %v4618_v37 }
 0xef4   :  { %4420 = vmatpush3.xpose.msk.msra.mxu1 %vm775_vm3, %v2723_v25 }
 0xef5   :  { %v4636_v28 = vpop.eup %4635  ;;  %2709 = vadd.xlane.f32.xlu0 %v2708_v27  ;;  %4421 = vmatprep.subr.mxu1 %v4870_v13 }
 0xef6   :  { %v2722_v29 = vmul.f32 %v4636_v28, %v5428_v38 }
 0xef8   :  { %4422 = vmatpush3.xpose.msk.msra.mxu1 %vm775_vm3, %v2722_v29 }
 0xef9   :  { %4433 = vmatprep.subr.mxu1 %v4870_v13 }
 0xf11   :  { %v2770_v17 = vpop.trf.xlu0 }
 0xf12   :  { %4424 = vmatmul.mubr.msk.f32.vlgmr.msra.gmra.mxu1 %vm775_vm3, %v2770_v17 }
 0xf13   :  { %4437 = vmatprep.mubr.msk.f32.mxu1 %vm4871_vm1, %v4870_v13 }
 0xf22   :  { %2818 = vxpose.xlu0.b32.start [1/2] (short) (narrow) %v2739_v62, 8 }
 0xf26   :  { %2819 = vxpose.xlu0.b32.end [2/2] (short) (narrow) %v2741_v4, 8 }
 0xf2d   :  { %v2704_v34 = vpop.xlane.xlu1 %2703 }
 0xf34   :  { %v2735_v18 = vpop.permute.xlu0 %2734 }
 0xf35   :  { %2786 = vxpose.xlu1.b32.start [1/2] (short) (narrow) %v2735_v18, 8 }
 0xf38   :  { %v2743_v31 = vpop.permute.xlu0 %2742 }
 0xf39   :  { %2787 = vxpose.xlu1.b32.end [2/2] (short) (narrow) %v2737_v58, 8  ;;  %2850 = vxpose.xlu0.b32.start [1/2] (short) (narrow) %v2743_v31, 8 }
 0xf3d   :  { %2851 = vxpose.xlu0.b32.end [2/2] (short) (narrow) %v2745_v7, 8 }
 0xf6e   :  { %v2701_v47 = vpop.xlane.xlu0 %2700 }
 0xf6f   :  { %4637 = vrcp.f32 %v2701_v47 }
 0xf72   :  { %v2707_v36 = vpop.xlane.xlu0 %2706 }
 0xf73   :  { %4639 = vrcp.f32 %v2707_v36 }
 0xf74   :  { %4641 = vrcp.f32 %v2704_v34 }
 0xf76   :  { %v2698_v37 = vpop.xlane.xlu0 %2697 }
 0xf77   :  { %4643 = vrcp.f32 %v2698_v37 }
 0xf7a   :  { %v2713_v51 = vpop.xlane.xlu0 %2712 }
 0xf7b   :  { %4645 = vrcp.f32 %v2713_v51 }
 0xf7c   :  { %v4638_v11 = vpop.eup %4637 }
 0xf7d   :  { %v2725_v38 = vmul.f32 %v4638_v11, %v4624_v6 }
 0xf7e   :  { %v2710_v52 = vpop.xlane.xlu0 %2709 }
 0xf7f   :  { %4427 = vmatpush3.xpose.msk.msra.mxu0 %vm775_vm3, %v2725_v38  ;;  %4647 = vrcp.f32 %v2710_v52 }
 0xf80   :  { %v4640_v41 = vpop.eup %4639  ;;  %4428 = vmatprep.subr.mxu0 %v4870_v13 }
 0xf81   :  { %v2727_v43 = vmul.f32 %v4640_v41, %v4626_v12  ;;  %v4642_v44 = vpop.eup %4641 }
 0xf82   :  { %v2726_v50 = vmul.f32 %v4642_v44, %v5432_v53 }
 0xf83   :  { %4434 = vmatpush3.xpose.msk.msra.mxu1 %vm775_vm3, %v2727_v43 }
 0xf84   :  { %v4644_v48 = vpop.eup %4643  ;;  %4435 = vmatprep.subr.mxu1 %v4870_v13 }
 0xf85   :  { %v2724_v49 = vmul.f32 %v4644_v48, %v4628_v16 }
 0xf87   :  { %4429 = vmatpush3.xpose.msk.msra.mxu0 %vm775_vm3, %v2724_v49  ;;  %4436 = vmatpush3.xpose.msk.msra.mxu1 %vm775_vm3, %v2726_v50 }
 0xf88   :  { %4440 = vmatprep.subr.mxu0 %v4870_v13  ;;  %4447 = vmatprep.subr.bf16.mxu1 %v4870_v13  ;;  %v4646_v55 = vpop.eup %4645 }
 0xf89   :  { %v2729_v56 = vmul.f32 %v4646_v55, %v4630_v20 }
 0xf8c   :  { %v4648_v58 = vpop.eup %4647 }
 0xf8d   :  { %v2728_v59 = vmul.f32 %v4648_v58, %v5444_v21 }
 0xf9e   :  { %v2834_v54 = vpop.trf.xlu0 }
 0xf9f   :  { %4438 = vmatmul.mubr.msk.f32.vlgmr.msra.gmra.mxu1 %vm775_vm3, %v2834_v54 }
 0xfa0   :  { %4451 = vmatprep.mubr.msk.bf16.mxu1 %vm4871_vm1, %v4870_v13 }
 0xfb1   :  { %v2802_v53 = vpop.trf.xlu1 }
 0xfb2   :  { %4431 = vmatmul.mubr.msk.f32.vlgmr.msra.gmra.mxu0 %vm775_vm3, %v2802_v53 }
 0xfb3   :  { %4441 = vmatpush3.xpose.msk.msra.mxu0 %vm775_vm3, %v2729_v56  ;;  %4444 = vmatprep.mubr.msk.f32.mxu0 %vm4871_vm1, %v4870_v13 }
 0xfb4   :  { %4442 = vmatprep.subr.mxu0 %v4870_v13 }
 0xfb5   :  { %v2866_v60 = vpop.trf.xlu0 }
 0xfb7   :  { %4443 = vmatpush3.xpose.msk.msra.mxu0 %vm775_vm3, %v2728_v59 }
 0xfb8   :  { %4455 = vmatprep.subr.bf16.mxu0 %v4870_v13 }
 0xfba   :  { %4445 = vmatmul.mubr.msk.f32.vlgmr.msra.gmra.mxu0 %vm775_vm3, %v2866_v60 }
 0xfbb   :  { %4459 = vmatprep.mubr.msk.bf16.mxu0 %vm4871_vm1, %v4870_v13 }
 0xfd2   :  { %v2957_v61 = vpop.f32.mrf.mxu1 }
 0xfd3   :  { %3198 = vxpose.xlu1.b32.start.end [1/1] (short) (narrow) %v2957_v61, 16 }
 0xfd4   :  { %v4425_v62 = vpop.f32.mrf.mxu1 }
0x104f   :  { %v3214_v42 = vpop.trf.xlu1 }
0x1053   :  { %v3215_v5 = vpop.trf.xlu1 }
0x105f   :  { %v3115_v63 = vpop.f32.mrf.mxu1 }
0x1060   :  { %3262 = vxpose.xlu0.b32.start.end [1/1] (short) (narrow) %v3115_v63, 16 }
0x1061   :  { %v4439_v0 = vpop.f32.mrf.mxu1 }
0x1072   :  { %v3036_v1 = vpop.f32.mrf.mxu0 }
0x1073   :  { %3230 = vxpose.xlu1.b32.start.end [1/1] (short) (narrow) %v3036_v1, 16 }
0x1074   :  { %v4432_v2 = vpop.f32.mrf.mxu0 }
0x107a   :  { %v3194_v3 = vpop.f32.mrf.mxu0 }
0x107b   :  { %3294 = vxpose.xlu1.b32.start.end [1/1] (short) (narrow) %v3194_v3, 16 }
0x107c   :  { %v4446_v4 = vpop.f32.mrf.mxu0 }
0x10dc   :  { %v3278_v7 = vpop.trf.xlu0 }
0x10dd   :  { %v3326_v9 = vcombine.low %v3214_v42, %v3278_v7  ;;  %v3327_v10 = vcombine.high %v3214_v42, %v3278_v7  ;;  %v4557_v42 = vld [vmem:[%s5615_s6 + $0x18] sm:$0xff]  }
0x10de   :  { %4448 = vmatpush3.bf16.msra.mxu1 %v4557_v42 }
0x10df   :  { %v3334_v19 = vrot.slane %v3326_v9, %v5196_v26  ;;  %v3341_v20 = vrot.slane %v3327_v10, %v5196_v26  ;;  %4449 = vmatprep.subr.bf16.mxu1 %v4870_v13 }
0x10e0   :  { %v3279_v8 = vpop.trf.xlu0 }
0x10e1   :  { %v3394_v24 = vcombine.low %v3215_v5, %v3279_v8  ;;  %v3395_v25 = vcombine.high %v3215_v5, %v3279_v8 }
0x10e3   :  { %v3402_v38 = vrot.slane %v3394_v24, %v5196_v26  ;;  %v3409_v41 = vrot.slane %v3395_v25, %v5196_v26 }
0x10ef   :  { %v3246_v45 = vpop.trf.xlu1 }
0x10f3   :  { %v3247_v6 = vpop.trf.xlu1 }
0x10f7   :  { %v3310_v12 = vpop.trf.xlu1 }
0x10f8   :  { %v3342_v14 = vcombine.low %v3246_v45, %v3310_v12  ;;  %v3343_v16 = vcombine.high %v3246_v45, %v3310_v12 }
0x10fa   :  { %v3350_v21 = vrot.slane %v3342_v14, %v5196_v26  ;;  %v3357_v23 = vrot.slane %v3343_v16, %v5196_v26 }
0x10fb   :  { %v3311_v27 = vpop.trf.xlu1 }
0x10fc   :  { %v3358_v28 = vcombine.low %v3334_v19, %v3350_v21  ;;  %v3359_v29 = vcombine.high %v3334_v19, %v3350_v21  ;;  %v3374_v17 = vcombine.low %v3341_v20, %v3357_v23  ;;  %v3375_v18 = vcombine.high %v3341_v20, %v3357_v23  ;;  %v4558_v23 = vld [vmem:[%s5615_s6 + $0x10] sm:$0xff]  }
0x10fd   :  { %v3410_v31 = vcombine.low %v3247_v6, %v3311_v27  ;;  %v3411_v47 = vcombine.high %v3247_v6, %v3311_v27  ;;  %4450 = vmatpush3.bf16.msra.mxu1 %v4558_v23 }
0x10fe   :  { %v3366_v34 = vrot.slane %v3358_v28, %v5199_v35  ;;  %v3373_v36 = vrot.slane %v3359_v29, %v5199_v35  ;;  %v3382_v37 = vrot.slane %v3374_v17, %v5199_v35  ;;  %v3389_v11 = vrot.slane %v3375_v18, %v5199_v35  ;;  %4463 = vmatprep.subr.bf16.mxu1 %v4870_v13 }
0x10ff   :  { %v3418_v43 = vrot.slane %v3410_v31, %v5196_v26  ;;  %v3425_v44 = vrot.slane %v3411_v47, %v5196_v26 }
0x1100   :  { %v3462_v48 = vcombine.low %v3366_v34, %v3373_v36  ;;  %v4186_v49 = vcombine.high %v3366_v34, %v3373_v36  ;;  %v3478_v50 = vcombine.low %v3382_v37, %v3389_v11  ;;  %v4187_v51 = vcombine.high %v3382_v37, %v3389_v11 }
0x1101   :  { %v3426_v52 = vcombine.low %v3402_v38, %v3418_v43  ;;  %v3427_v54 = vcombine.high %v3402_v38, %v3418_v43  ;;  %v3442_v55 = vcombine.low %v3409_v41, %v3425_v44  ;;  %v3443_v53 = vcombine.high %v3409_v41, %v3425_v44 }
0x1102   :  { %v3469_v56 = vrot.slane %v3462_v48, %v5196_v26  ;;  %v3477_v58 = vrot.slane %v4186_v49, %v5196_v26  ;;  %v3485_v59 = vrot.slane %v3478_v50, %v5196_v26  ;;  %v3493_v60 = vrot.slane %v4187_v51, %v5196_v26 }
0x1103   :  { %v3434_v61 = vrot.slane %v3426_v52, %v5199_v35  ;;  %v3441_v62 = vrot.slane %v3427_v54, %v5199_v35  ;;  %v3450_v63 = vrot.slane %v3442_v55, %v5199_v35  ;;  %v3457_v0 = vrot.slane %v3443_v53, %v5199_v35 }
0x1104   :  { %v3495_v1 = vcombine.high %v3469_v56, %v3477_v58  ;;  %v3511_v2 = vcombine.high %v3485_v59, %v3493_v60  ;;  %v3494_v3 = vcombine.low %v3469_v56, %v3477_v58  ;;  %v3510_v4 = vcombine.low %v3485_v59, %v3493_v60 }
0x1105   :  { %v3530_v5 = vcombine.low %v3434_v61, %v3441_v62  ;;  %v4188_v45 = vcombine.high %v3434_v61, %v3441_v62  ;;  %v3546_v7 = vcombine.low %v3450_v63, %v3457_v0  ;;  %v4189_v6 = vcombine.high %v3450_v63, %v3457_v0  ;;  %v5535_v0 = vld [vmem:[%s5619_s10 + $0x8] sm:$0x3f] }
0x1106   :  { %v3502_v9 = vrot.slane %v3494_v3, %v5199_v35  ;;  %v3518_v10 = vrot.slane %v3510_v4, %v5199_v35  ;;  %v3509_v19 = vrot.slane %v3495_v1, %v5199_v35  ;;  %v3525_v20 = vrot.slane %v3511_v2, %v5199_v35 }
0x1107   :  { %v3537_v12 = vrot.slane %v3530_v5, %v5196_v26  ;;  %v3545_v8 = vrot.slane %v4188_v45, %v5196_v26  ;;  %v3553_v14 = vrot.slane %v3546_v7, %v5196_v26  ;;  %v3561_v16 = vrot.slane %v4189_v6, %v5196_v26 }
0x1108   :  { %v3526_v21 = vcombine.low %v3502_v9, %v3518_v10  ;;  %v3528_v31 = vcombine.low %v3509_v19, %v3525_v20  ;;  %v3527_v34 = vcombine.high %v3502_v9, %v3518_v10  ;;  %v3529_v43 = vcombine.high %v3509_v19, %v3525_v20 }
0x1109   :  { %v3563_v24 = vcombine.high %v3537_v12, %v3545_v8  ;;  %v3579_v25 = vcombine.high %v3553_v14, %v3561_v16  ;;  %v3562_v27 = vcombine.low %v3537_v12, %v3545_v8  ;;  %v3578_v28 = vcombine.low %v3553_v14, %v3561_v16 }
0x110a   :  { %v3637_v1 = vrot.slane %v5535_v0, %v5019_v33 }
0x110b   :  { %v3577_v29 = vrot.slane %v3563_v24, %v5199_v35  ;;  %v3593_v26 = vrot.slane %v3579_v25, %v5199_v35  ;;  %v3570_v17 = vrot.slane %v3562_v27, %v5199_v35  ;;  %v3586_v18 = vrot.slane %v3578_v28, %v5199_v35 }
0x110d   :  { %v3596_v47 = vcombine.low %v3577_v29, %v3593_v26  ;;  %v3595_v36 = vcombine.high %v3570_v17, %v3586_v18  ;;  %v3594_v37 = vcombine.low %v3570_v17, %v3586_v18  ;;  %v3597_v41 = vcombine.high %v3577_v29, %v3593_v26 }
0x110f   :  { %v4535_v11 = vpack.i.bf16 %v3596_v47, %v3528_v31  ;;  %v4530_v38 = vpack.i.bf16 %v3595_v36, %v3527_v34  ;;  %v4540_v44 = vpack.i.bf16 %v3597_v41, %v3529_v43 }
0x1111   :  { %4536 = vrot.lane.b32.xlu1 %v4535_v11, %s4862_s20  ;;  %4531 = vrot.lane.b32.xlu0 %v4530_v38, %s4859_s28 }
0x1115   :  { %4541 = vrot.lane.b32.xlu1 %v4540_v44, %s4878_s27 }
0x1183   :  { %v4537_v48 = vpop.permute.xlu1 %4536  ;;  %v4532_v35 = vpop.permute.xlu0 %4531 }
0x1184   :  { %v4534_v49 = vunpack.i.h.bf16 %v4532_v35  ;;  %v4533_v50 = vunpack.i.l.bf16 %v4532_v35  ;;  %v4539_v51 = vunpack.i.h.bf16 %v4537_v48  ;;  %v4538_v52 = vunpack.i.l.bf16 %v4537_v48 }
0x1185   :  { %v3737_v35 = vrot.slane %v5535_v0, %v5277_v57 }
0x1186   :  { %v3622_v54 = vsel %vm458_vm2, %v3526_v21, %v4533_v50  ;;  %v3623_v55 = vsel %vm458_vm2, %v3594_v37, %v4534_v49  ;;  %v3731_v37 = vrot.slane %v5535_v0, %v5023_v39  ;;  %v4561_v39 = vld [vmem:[%s5618_s9 + $0x38] sm:$0xff]  }
0x1187   :  { %v4542_v53 = vpop.permute.xlu1 %4541  ;;  %v3624_v59 = vsel %vm775_vm3, %v3622_v54, %v4538_v52  ;;  %v3625_v60 = vsel %vm775_vm3, %v3623_v55, %v4539_v51  ;;  %v4562_v54 = vld [vmem:[%s5618_s9 + $0x30] sm:$0xff]   ;;  %v4563_v55 = vld [vmem:[%s5618_s9 + $0x28] sm:$0xff]  }
0x1188   :  { %v4544_v56 = vunpack.i.h.bf16 %v4542_v53  ;;  %v4543_v58 = vunpack.i.l.bf16 %v4542_v53  ;;  %v4564_v53 = vld [vmem:[%s5618_s9 + $0x20] sm:$0xff]  }
0x118a   :  { %v3626_v61 = vsel %vm1760_vm4, %v3624_v59, %v4543_v58  ;;  %v3627_v62 = vsel %vm1760_vm4, %v3625_v60, %v4544_v56  ;;  %v4201_v56 = vld [vmem:[#allocation11 + $0x1] ss:$0 sm:$0xff] }
0x118b   :  { %v3628_v63 = vpack.c.bf16 %v3627_v62, %v3626_v61 }
0x118d   :  { %4452 = vmatmul.mubr.msk.bf16.vlgmr.msra.gmra.mxu1 %vm164_vm0, %v3628_v63 }
0x118e   :  { %4471 = vmatprep.mubr.msk.bf16.mxu1 %vm4871_vm1, %v4870_v13  ;;  %4464 = vmatpush3.bf16.msra.mxu1 %v4561_v39 }
0x118f   :  { %4465 = vmatprep.subr.bf16.mxu1 %v4870_v13 }
0x1192   :  { %4466 = vmatpush3.bf16.msra.mxu1 %v4562_v54 }
0x1193   :  { %4467 = vmatprep.subr.bf16.mxu1 %v4870_v13 }
0x1196   :  { %4468 = vmatpush3.bf16.msra.mxu1 %v4563_v55 }
0x1197   :  { %4469 = vmatprep.subr.bf16.mxu1 %v4870_v13 }
0x119a   :  { %4470 = vmatpush3.bf16.msra.mxu1 %v4564_v53 }
0x124d   :  { %v3687_v2 = vpop.f32.mrf.mxu1 }
0x124e   :  { %v3688_v3 = vadd.f32 %v3687_v2, %v3637_v1 }
0x124f   :  { %v4453_v4 = vpop.f32.mrf.mxu1 }
0x1250   :  { %v3694_v42 = vadd.f32 %v3688_v3, %v5323_v30  ;;  %v4559_v30 = vld [vmem:[%s5616_s7 + $0x18] sm:$0xff]  }
0x1251   :  { %v3690_v5 = vpop.f32.mrf.mxu1  ;;  %4456 = vmatpush3.bf16.msra.mxu0 %v4559_v30 }
0x1252   :  { %v3691_v45 = vadd.f32 %v3690_v5, %v3637_v1  ;;  %v3696_v7 = vsel %vm164_vm0, %v3694_v42, 0.0  ;;  %v3704_v8 = vmul.f32 %v3694_v42, %v3694_v42  ;;  %4457 = vmatprep.subr.bf16.mxu0 %v4870_v13 }
0x1253   :  { %3697 = vadd.xlane.f32.xlu1 %v3696_v7  ;;  %v4454_v6 = vpop.f32.mrf.mxu1 }
0x1254   :  { %v3695_v9 = vadd.f32 %v3691_v45, %v5325_v46  ;;  %v3706_v14 = vsel %vm164_vm0, %v3704_v8, 0.0  ;;  %v4560_v46 = vld [vmem:[%s5616_s7 + $0x10] sm:$0xff]  }
0x1255   :  { %4458 = vmatpush3.bf16.msra.mxu0 %v4560_v46 }
0x1256   :  { %v3699_v10 = vsel %vm164_vm0, %v3695_v9, 0.0  ;;  %v3705_v12 = vmul.f32 %v3695_v9, %v3695_v9  ;;  %4475 = vmatprep.subr.bf16.mxu0 %v4870_v13 }
0x1257   :  { %3700 = vadd.xlane.f32.xlu0 %v3699_v10 }
0x1258   :  { %v3709_v33 = vsel %vm164_vm0, %v3705_v12, 0.0 }
0x1259   :  { %3710 = vadd.xlane.f32.xlu1 %v3709_v33 }
0x125b   :  { %3707 = vadd.xlane.f32.xlu0 %v3706_v14 }
0x12dc   :  { %v3698_v16 = vpop.xlane.xlu1 %3697 }
0x12dd   :  { %v3702_v20 = vmul.f32 0.03125, %v3698_v16 }
0x12df   :  { %v3714_v28 = vmul.f32 %v3702_v20, %v3702_v20  ;;  %v3720_v38 = vsub.f32 %v3694_v42, %v3702_v20  ;;  %v3841_v20 = vrot.slane %v5535_v0, %v1971_v40 }
0x12e0   :  { %v3701_v19 = vpop.xlane.xlu0 %3700 }
0x12e1   :  { %v3703_v21 = vmul.f32 0.03125, %v3701_v19 }
0x12e2   :  { %v3711_v23 = vpop.xlane.xlu1 %3710 }
0x12e3   :  { %v3715_v24 = vmul.f32 %v3703_v21, %v3703_v21  ;;  %v3713_v25 = vmul.f32 0.03125, %v3711_v23  ;;  %v3721_v36 = vsub.f32 %v3695_v9, %v3703_v21 }
0x12e4   :  { %v3708_v27 = vpop.xlane.xlu0 %3707 }
0x12e5   :  { %v3717_v29 = vsub.f32 %v3713_v25, %v3715_v24  ;;  %v3712_v26 = vmul.f32 0.03125, %v3708_v27 }
0x12e7   :  { %v3719_v17 = vmax.f32 %v3717_v29, 0.0  ;;  %v3716_v18 = vsub.f32 %v3712_v26, %v3714_v28 }
0x12e9   :  { %v3723_v31 = vadd.f32 1e-12, %v3719_v17  ;;  %v3718_v47 = vmax.f32 %v3716_v18, 0.0 }
0x12eb   :  { %4649 = vrsqrt.f32 %v3723_v31  ;;  %v3722_v34 = vadd.f32 1e-12, %v3718_v47 }
0x12ed   :  { %4651 = vrsqrt.f32 %v3722_v34 }
0x12f8   :  { %v4650_v11 = vpop.eup %4649 }
0x12f9   :  { %v3727_v41 = vmul.f32 %v4650_v11, %v3721_v36  ;;  %v4565_v36 = vld [vmem:[%s5620_s11 + $0x8] sm:$0xff]  }
0x12fa   :  { %v4652_v43 = vpop.eup %4651 }
0x12fb   :  { %v3726_v44 = vmul.f32 %v4652_v43, %v3720_v38  ;;  %v3733_v48 = vmul.f32 %v3731_v37, %v3727_v41 }
0x12fd   :  { %v3732_v49 = vmul.f32 %v3731_v37, %v3726_v44  ;;  %v3739_v51 = vadd.f32 %v3737_v35, %v3733_v48  ;;  %v4566_v37 = vld [vmem:[%s5620_s11] sm:$0xff]  }
0x12ff   :  { %v3738_v50 = vadd.f32 %v3737_v35, %v3732_v49 }
0x1301   :  { %v3740_v52 = vpack.c.bf16 %v3739_v51, %v3738_v50 }
0x1303   :  { %4460 = vmatmul.mubr.msk.bf16.vlgmr.msra.gmra.mxu0 %vm164_vm0, %v3740_v52 }
0x1304   :  { %4479 = vmatprep.mubr.msk.bf16.mxu0 %vm4871_vm1, %v4870_v13  ;;  %4476 = vmatpush3.bf16.msra.mxu0 %v4565_v36 }
0x1305   :  { %4477 = vmatprep.subr.bf16.mxu0 %v4870_v13 }
0x1308   :  { %4478 = vmatpush3.bf16.msra.mxu0 %v4566_v37 }
0x1309   :  { %4483 = vmatprep.subr.bf16.mxu0 %v4870_v13 }
0x13c3   :  { %v3803_v58 = vpop.f32.mrf.mxu0 }
0x13c4   :  { %v3804_v59 = vadd.f32 %v4201_v56, %v3803_v58  ;;  %v3947_v58 = vrot.slane %v5535_v0, %v2078_v15 }
0x13c5   :  { %v4461_v60 = vpop.f32.mrf.mxu0 }
0x13c6   :  { %v3810_v61 = vmul.f32 %v3804_v59, %v3804_v59 }
0x13c7   :  { %v3806_v62 = vpop.f32.mrf.mxu0 }
0x13c8   :  { %v3812_v63 = vmul.f32 %v3810_v61, %v3804_v59  ;;  %v3807_v1 = vadd.f32 %v4201_v56, %v3806_v62 }
0x13c9   :  { %v4462_v2 = vpop.f32.mrf.mxu0 }
0x13ca   :  { %v3814_v3 = vmul.f32 0.044715, %v3812_v63  ;;  %v3811_v4 = vmul.f32 %v3807_v1, %v3807_v1 }
0x13cc   :  { %v3816_v42 = vadd.f32 %v3814_v3, %v3804_v59  ;;  %v3813_v5 = vmul.f32 %v3811_v4, %v3807_v1 }
0x13ce   :  { %v3818_v45 = vmul.f32 0.7978846, %v3816_v42  ;;  %v3815_v7 = vmul.f32 0.044715, %v3813_v5 }
0x13d0   :  { %4653 = vtanh.f32 %v3818_v45  ;;  %v3817_v6 = vadd.f32 %v3815_v7, %v3807_v1 }
0x13d2   :  { %v3819_v9 = vmul.f32 0.7978846, %v3817_v6 }
0x13d4   :  { %4655 = vtanh.f32 %v3819_v9 }
0x13dd   :  { %v4654_v10 = vpop.eup %4653 }
0x13de   :  { %v3822_v12 = vadd.f32 1.0, %v4654_v10 }
0x13e0   :  { %v3824_v33 = vmul.f32 0.5, %v3822_v12 }
0x13e1   :  { %v4656_v8 = vpop.eup %4655 }
0x13e2   :  { %v3823_v14 = vadd.f32 1.0, %v4656_v8  ;;  %v3826_v46 = vmul.f32 %v3824_v33, %v3804_v59 }
0x13e4   :  { %v3825_v30 = vmul.f32 0.5, %v3823_v14 }
0x13e6   :  { %v3827_v16 = vmul.f32 %v3825_v30, %v3807_v1  ;;  %v3953_v1 = vrot.slane %v5535_v0, %v2084_v22  ;;  %v4568_v22 = vld [vmem:[#allocation13] sm:$0xff]   ;;  %v4663_v0 = vld [vmem:[#allocation14] sm:$0x7] }
0x13e7   :  { %v3965_v8 = vrot.slane %v4663_v0, %v5277_v57 }
0x13e8   :  { %v3828_v19 = vpack.c.bf16 %v3827_v16, %v3826_v46 }
0x13ea   :  { %4472 = vmatmul.mubr.msk.bf16.vlgmr.msra.gmra.mxu1 %vm1997_vm5, %v3828_v19 }
0x14aa   :  { %v3903_v21 = vpop.f32.mrf.mxu1 }
0x14ab   :  { %v3904_v23 = vadd.f32 %v3903_v21, %v3841_v20  ;;  %v4221_v21 = vld [vmem:[%s5623_s14] ss:$0 sm:$0xff] }
0x14ac   :  { %v4473_v24 = vpop.f32.mrf.mxu1 }
0x14ad   :  { %v3910_v25 = vadd.f32 %v3904_v23, %v3738_v50 }
0x14ae   :  { %v3906_v27 = vpop.f32.mrf.mxu1 }
0x14af   :  { %v3907_v28 = vadd.f32 %v3906_v27, %v3841_v20  ;;  %v3912_v29 = vsel %vm164_vm0, %v3910_v25, 0.0  ;;  %v3920_v26 = vmul.f32 %v3910_v25, %v3910_v25 }
0x14b0   :  { %3913 = vadd.xlane.f32.xlu1 %v3912_v29  ;;  %v4474_v17 = vpop.f32.mrf.mxu1 }
0x14b1   :  { %v3911_v18 = vadd.f32 %v3907_v28, %v3739_v51  ;;  %v3922_v31 = vsel %vm164_vm0, %v3920_v26, 0.0 }
0x14b3   :  { %v3915_v47 = vsel %vm164_vm0, %v3911_v18, 0.0  ;;  %v3921_v34 = vmul.f32 %v3911_v18, %v3911_v18 }
0x14b4   :  { %3923 = vadd.xlane.f32.xlu1 %v3922_v31  ;;  %3916 = vadd.xlane.f32.xlu0 %v3915_v47 }
0x14b5   :  { %v3925_v40 = vsel %vm164_vm0, %v3921_v34, 0.0 }
0x14b8   :  { %3926 = vadd.xlane.f32.xlu0 %v3925_v40 }
0x1539   :  { %v3914_v11 = vpop.xlane.xlu1 %3913 }
0x153a   :  { %v3918_v38 = vmul.f32 0.03125, %v3914_v11 }
0x153c   :  { %v3930_v44 = vmul.f32 %v3918_v38, %v3918_v38  ;;  %v3936_v59 = vsub.f32 %v3910_v25, %v3918_v38 }
0x153d   :  { %v3924_v41 = vpop.xlane.xlu1 %3923  ;;  %v3917_v43 = vpop.xlane.xlu0 %3916 }
0x153e   :  { %v3928_v48 = vmul.f32 0.03125, %v3924_v41  ;;  %v3919_v35 = vmul.f32 0.03125, %v3917_v43 }
0x1540   :  { %v3932_v49 = vsub.f32 %v3928_v48, %v3930_v44  ;;  %v3931_v52 = vmul.f32 %v3919_v35, %v3919_v35  ;;  %v3937_v63 = vsub.f32 %v3911_v18, %v3919_v35 }
0x1541   :  { %v3927_v50 = vpop.xlane.xlu0 %3926 }
0x1542   :  { %v3934_v51 = vmax.f32 %v3932_v49, 0.0  ;;  %v3929_v39 = vmul.f32 0.03125, %v3927_v50 }
0x1544   :  { %v3938_v54 = vadd.f32 1e-12, %v3934_v51  ;;  %v3933_v55 = vsub.f32 %v3929_v39, %v3931_v52 }
0x1546   :  { %4657 = vrsqrt.f32 %v3938_v54  ;;  %v3935_v53 = vmax.f32 %v3933_v55, 0.0 }
0x1548   :  { %v3939_v56 = vadd.f32 1e-12, %v3935_v53 }
0x154a   :  { %4659 = vrsqrt.f32 %v3939_v56 }
0x1553   :  { %v4658_v60 = vpop.eup %4657 }
0x1554   :  { %v3942_v61 = vmul.f32 %v4658_v60, %v3936_v59 }
0x1556   :  { %v3948_v62 = vmul.f32 %v3947_v58, %v3942_v61 }
0x1557   :  { %v4660_v2 = vpop.eup %4659 }
0x1558   :  { %v3943_v3 = vmul.f32 %v4660_v2, %v3937_v63  ;;  %v3954_v42 = vadd.f32 %v3953_v1, %v3948_v62 }
0x155a   :  { %v3949_v4 = vmul.f32 %v3947_v58, %v3943_v3  ;;  %v3956_v45 = vpack.c.bf16 %v3954_v42, %v3954_v42 }
0x155c   :  { %v3955_v5 = vadd.f32 %v3953_v1, %v3949_v4  ;;  %v3968_v9 = vunpack.c.l.b16 %v3956_v45 }
0x155e   :  { %v3957_v7 = vpack.c.bf16 %v3955_v5, %v3955_v5 }
0x1560   :  { %v3969_v6 = vunpack.c.l.b16 %v3957_v7 }
0x1562   :  { %v3970_v15 = vrot.slane %v3969_v6, 7 }
0x1564   :  { %v3972_v10 = vsel %vm3971_vm6, %v3970_v15, %v3968_v9 }
0x1565   :  { %v3973_v12 = vpack.c.b16 %v3972_v10, %v3972_v10 }
0x1567   :  { %4480 = vmatmul.mubr.msk.bf16.vlgmr.msra.gmra.mxu0 %vm164_vm0, %v3973_v12 }
0x1568   :  { %4487 = vmatprep.mubr.msk.bf16.mxu0 %vm4871_vm1, %v4870_v13  ;;  %4484 = vmatpush3.bf16.msra.mxu0 %v4567_v32 }
0x1569   :  { %4485 = vmatprep.subr.bf16.mxu0 %v4870_v13 }
0x156c   :  { %4486 = vmatpush3.bf16.msra.mxu0 %v4568_v22 }
0x1627   :  { %v4023_v33 = vpop.f32.mrf.mxu0 }
0x1628   :  { %v4024_v14 = vadd.f32 %v4023_v33, %v3965_v8 }
0x1629   :  { %v4481_v30 = vpop.f32.mrf.mxu0 }
0x162a   :  { %4661 = vtanh.f32 %v4024_v14 }
0x162b   :  { %v4026_v46 = vpop.f32.mrf.mxu0 }
0x162d   :  { %v4482_v16 = vpop.f32.mrf.mxu0 }
0x1637   :  { %v4662_v19 = vpop.eup %4661 }
0x1638   :  { %v4030_v20 = vpack.c.bf16 %v4662_v19, %v4662_v19 }
0x163a   :  { %4488 = vmatmul.mubr.msk.bf16.vlgmr.msra.gmra.mxu0 %vm164_vm0, %v4030_v20 }
0x16fa   :  { %v4091_v13 = vpop.f32.mrf.mxu0 }
0x16fb   :  { %v4092_v23 = vadd.f32 %v4221_v21, %v4091_v13 }
0x16fc   :  { %v4489_v57 = vpop.f32.mrf.mxu0 }
0x16fd   :  { %4097 = vst [vmem:[#allocation16] sm:$0x3] %v4092_v23 }
0x16fe   :  { %v4094_v24 = vpop.f32.mrf.mxu0 }
0x16ff   :  { %4835 = shalt.err (!%p4832_p2)
}
0x1700   :  { %4107 = dma.vmem_to_hbm [thread:$0]  %s4105_s23, 32, %s5624_s15, [#allocation4]   ;;  %v4490_v25 = vpop.f32.mrf.mxu0 }
0x1701   :  { %4854 = dma.done.wait [#allocation4], 32  }
0x1702   :  { %4855 = vsyncadd [#allocation4], 4294967264 }
0x1703   :  { %4111 = vsyncpa [#allocation3], 1 }
0x1704   :  { %4112 = vsyncpa [#allocation6], 1 }
0x1705   :  { %4113 = vsyncpa [#allocation9], 1 }
0x1706   :  { %4114 = vsyncpa [#allocation12], 1 }
0x1707   :  { %4115 = vsyncpa [#allocation15], 1 }
0x1708   :  { %4116 = vsyncpa [#allocation4], 1 }

</bundles_post_ra>
